<compile_context>
chip_gen: v5e
topology: v5e:2x2
jax: 0.10.0
libtpu: 0.0.40
codegen_flags: <defaults>
</compile_context>

<pallas_src>
import numpy as np
import jax
import jax.numpy as jnp
from jax import lax
from jax.experimental import pallas as pl
from jax.experimental.pallas import tpu as pltpu

# ----------------------------- static geometry ------------------------------
B = 2                        # batch
H1, W1 = 8, 12               # input spatial (two 2x2 pools -> 2x3, matching fc1 = 64*2*3)
C1, C2 = 32, 64              # conv output channels
NF1, NF2 = 40, 5             # fc1 / fc2 widths
LANES = 128

N1V = B * H1 * W1            # 192 valid conv1 output rows (b, y, x)
Y1ROWS = 208                 # conv1 scratch rows (>= N1V + W1 + 1 = 205, multiple of 8)

H2, W2 = 4, 6                # after pool1
HP2, WP2 = H2 + 2, W2 + 2    # zero-padded grid for conv2 ('same')
N2P = B * HP2 * WP2          # 96 padded conv2 rows (b, ip, jp)
X2B_OFF = 9                  # front margin so conv2 tap slices never go negative
X2B_ROWS = 120               # >= X2B_OFF + N2P + 9 + margin, multiple of 8
Y2ROWS = 112                 # conv2 output scratch (>= N2P + WP2 + 1 = 105, multiple of 8)

HO, WO = 2, 3                # after pool2 (flatten = 64*2*3 = 384)
NS = HO * WO                 # 6 spatial positions feeding fc1
FC1_ROWS = NS * 8            # 48: fc1 LHS rows, row 8*s + b


# ------------------------------ fused kernel --------------------------------
def _cnn_fused_kernel(lhs1_ref, w1c_ref, b1c_ref, w2c_ref, b2c_ref,
                      s1_ref, s2_ref, mask_ref,
                      w1f_ref, b1f_ref, w2f_ref, b2f_ref,
                      x2_out_ref, x1_out_ref,
                      y1_ref, x2b_ref, y2_ref):
    # ---- conv1: ONE im2col matmul (taps on K-rows 0..8) + bias + relu ----
    y1 = jnp.dot(lhs1_ref[...], w1c_ref[...], preferred_element_type=jnp.float32)
    y1 = jnp.maximum(y1 + b1c_ref[...], 0.0)
    y1_ref[0:N1V, :] = y1
    y1_ref[N1V:Y1ROWS, :] = jnp.zeros((Y1ROWS - N1V, LANES), jnp.float32)

    # ---- pool1: 3 full-buffer maxes over row-shifted views + one-hot scatter matmul ----
    m1 = jnp.maximum(
        jnp.maximum(y1_ref[0:N1V, :], y1_ref[1:N1V + 1, :]),
        jnp.maximum(y1_ref[W1:N1V + W1, :], y1_ref[W1 + 1:N1V + W1 + 1, :]))
    x2b_ref[...] = jnp.dot(s1_ref[...], m1.astype(jnp.bfloat16),
                           preferred_element_type=jnp.float32)

    # ---- conv2: 9 shifted matmuls over the zero-padded pooled map, register accum ----
    acc2 = jnp.dot(x2b_ref[0:N2P, :].astype(jnp.bfloat16), w2c_ref[0:LANES, :],
                   preferred_element_type=jnp.float32)
    for s in range(1, 9):
        dy, dx = divmod(s, 3)
        off = dy * WP2 + dx
        acc2 = acc2 + jnp.dot(x2b_ref[off:off + N2P, :].astype(jnp.bfloat16),
                              w2c_ref[s * LANES:(s + 1) * LANES, :],
                              preferred_element_type=jnp.float32)
    y2 = jnp.maximum(acc2 + b2c_ref[...], 0.0)
    y2_ref[0:N2P, :] = y2
    y2_ref[N2P:Y2ROWS, :] = jnp.zeros((Y2ROWS - N2P, LANES), jnp.float32)

    # ---- pool2 + dropout: full-buffer maxes + one-hot gather matmul (register-resident) ----
    m2 = jnp.maximum(
        jnp.maximum(y2_ref[0:N2P, :], y2_ref[1:N2P + 1, :]),
        jnp.maximum(y2_ref[WP2:N2P + WP2, :], y2_ref[WP2 + 1:N2P + WP2 + 1, :]))
    g = jnp.dot(s2_ref[...], m2.astype(jnp.bfloat16),
                preferred_element_type=jnp.float32)
    gm = (g * mask_ref[...]).astype(jnp.bfloat16)           # [48,128], row 8*s + b

    # ---- fc1: 6 spatial blocks accumulated in registers, then sigmoid ----
    h = jnp.dot(gm[0:8, :], w1f_ref[0:LANES, :], preferred_element_type=jnp.float32)
    for s in range(1, NS):
        h = h + jnp.dot(gm[8 * s:8 * (s + 1), :],
                        w1f_ref[s * LANES:(s + 1) * LANES, :],
                        preferred_element_type=jnp.float32)
    z = h + b1f_ref[...]
    x1v = pl.reciprocal(1.0 + jnp.exp(-z), approx=True)      # sigmoid; recip on the EUP
    x1_out_ref[...] = x1v

    # ---- fc2 (tiny; kept f32) ----
    x2_out_ref[...] = jnp.dot(x1v, w2f_ref[...],
                              preferred_element_type=jnp.float32) + b2f_ref[...]


_fused_forward = pl.pallas_call(
    _cnn_fused_kernel,
    out_shape=(jax.ShapeDtypeStruct((8, LANES), jnp.float32),   # fc2 logits (padded)
               jax.ShapeDtypeStruct((8, LANES), jnp.float32)),  # sigmoid(fc1) (padded)
    in_specs=[pl.BlockSpec(memory_space=pltpu.MemorySpace.VMEM)] * 12,
    out_specs=(pl.BlockSpec(memory_space=pltpu.MemorySpace.VMEM),
               pl.BlockSpec(memory_space=pltpu.MemorySpace.VMEM)),
    scratch_shapes=[pltpu.VMEM((Y1ROWS, LANES), jnp.float32),   # conv1 output (+zero tail)
                    pltpu.VMEM((X2B_ROWS, LANES), jnp.float32), # padded pooled map
                    pltpu.VMEM((Y2ROWS, LANES), jnp.float32)],  # conv2 output (+zero tail)
)


# ------------------------ parameter init & one-time prep --------------------
def init_params(key):
    """Synthetic parameters with the exact shapes of CNNClassifier.__init__ (torch layout)."""
    ks = jax.random.split(key, 8)
    s = 0.1
    return {
        "conv1_w": s * jax.random.normal(ks[0], (C1, 1, 3, 3), jnp.float32),
        "conv1_b": s * jax.random.normal(ks[1], (C1,), jnp.float32),
        "conv2_w": s * jax.random.normal(ks[2], (C2, C1, 3, 3), jnp.float32),
        "conv2_b": s * jax.random.normal(ks[3], (C2,), jnp.float32),
        "fc1_w":   s * jax.random.normal(ks[4], (NF1, C2 * HO * WO), jnp.float32),
        "fc1_b":   s * jax.random.normal(ks[5], (NF1,), jnp.float32),
        "fc2_w":   s * jax.random.normal(ks[6], (NF2, NF1), jnp.float32),
        "fc2_b":   s * jax.random.normal(ks[7], (NF2,), jnp.float32),
    }


def _selection_matrices():
    """One-hot row-selection matrices for the two pools (built once, static)."""
    s1 = np.zeros((X2B_ROWS, N1V), np.float32)   # scatter pooled1 -> padded conv2 layout
    for b in range(B):
        for i in range(H2):
            for j in range(W2):
                dst = X2B_OFF + b * HP2 * WP2 + (i + 1) * WP2 + (j + 1)
                src = b * H1 * W1 + (2 * i) * W1 + (2 * j)
                s1[dst, src] = 1.0
    s2 = np.zeros((FC1_ROWS, N2P), np.float32)   # gather pooled2 -> fc1 LHS rows 8*s + b
    for b in range(B):
        for io in range(HO):
            for jo in range(WO):
                s = io * WO + jo
                src = b * HP2 * WP2 + (2 * io + 1) * WP2 + (2 * jo + 1)
                s2[8 * s + b, src] = 1.0
    return jnp.asarray(s1, jnp.bfloat16), jnp.asarray(s2, jnp.bfloat16)


def prepare_params(p):
    """One-time weight prep: transpose + zero-pad to 128-lane matrices, cast to bf16."""
    def pad_bias(b):
        return jnp.zeros((1, LANES), jnp.float32).at[0, :b.shape[0]].set(b)

    # conv1 [32,1,3,3] -> [128,128]: K-row dy*3+dx, col = cout   (cin == 1)
    w1 = jnp.transpose(p["conv1_w"], (2, 3, 1, 0)).reshape(9, C1)
    w1c = (jnp.zeros((LANES, LANES), jnp.float32)
           .at[:9, :C1].set(w1).astype(jnp.bfloat16))

    # conv2 [64,32,3,3] -> [9*128,128]: block s, rows = cin, cols = cout
    taps = jnp.transpose(p["conv2_w"], (2, 3, 1, 0)).reshape(9, C1, C2)
    w2c = (jnp.zeros((9, LANES, LANES), jnp.float32)
           .at[:, :C1, :C2].set(taps)
           .reshape(9 * LANES, LANES).astype(jnp.bfloat16))

    # fc1 [40, 384] (torch flat index c*6 + s) -> [6*128,128]: block s, rows = c, cols = n
    wf1 = jnp.transpose(p["fc1_w"].reshape(NF1, C2, NS), (2, 1, 0))     # [s, c, n]
    w1f = (jnp.zeros((NS, LANES, LANES), jnp.float32)
           .at[:, :C2, :NF1].set(wf1)
           .reshape(NS * LANES, LANES).astype(jnp.bfloat16))

    # fc2 [5, 40] -> [128,128] (kept f32; tiny)
    w2f = jnp.zeros((LANES, LANES), jnp.float32).at[:NF1, :NF2].set(p["fc2_w"].T)

    s1, s2 = _selection_matrices()
    return {
        "w1c": w1c, "b1c": pad_bias(p["conv1_b"]),
        "w2c": w2c, "b2c": pad_bias(p["conv2_b"]),
        "w1f": w1f, "b1f": pad_bias(p["fc1_b"]),
        "w2f": w2f, "b2f": pad_bias(p["fc2_b"]),
        "s1": s1, "s2": s2,
    }


# --------------------------------- forward ----------------------------------
@jax.jit
def cnn_classifier_forward(kparams, x_nchw, dropout_keep):
    """x_nchw: [B,1,8,12] f32.  dropout_keep: [B,6,64] 0/1 f32 (keep mask).
    Returns (x2, x1) exactly like the PyTorch module: (fc2 logits, sigmoid(fc1))."""
    # conv1 im2col: rows = (b, y, x) over the 8x12 valid grid, lanes 0..8 = 3x3 taps
    xp = jnp.pad(x_nchw.reshape(B, H1, W1), ((0, 0), (1, 1), (1, 1)))
    taps = [xp[:, dy:dy + H1, dx:dx + W1] for dy in range(3) for dx in range(3)]
    lhs1 = jnp.stack(taps, axis=-1).reshape(B * H1 * W1, 9)
    lhs1 = jnp.pad(lhs1, ((0, 0), (0, LANES - 9))).astype(jnp.bfloat16)

    # Inverted-dropout mask (scaled by 1/(1-p)) laid out as fc1 LHS rows: row 8*s + b.
    m = jnp.transpose(dropout_keep, (1, 0, 2)) * 2.0                  # [6, B, 64]
    mask48 = jnp.pad(m, ((0, 0), (0, 8 - B), (0, LANES - C2))).reshape(FC1_ROWS, LANES)

    x2_pad, x1_pad = _fused_forward(
        lhs1, kparams["w1c"], kparams["b1c"], kparams["w2c"], kparams["b2c"],
        kparams["s1"], kparams["s2"], mask48,
        kparams["w1f"], kparams["b1f"], kparams["w2f"], kparams["b2f"])
    return x2_pad[:B, :NF2], x1_pad[:B, :NF1]


# ------------------------------ pure-JAX reference ---------------------------
def reference_forward(params, x_nchw, dropout_keep):
    def conv_same(x, w, b):
        y = lax.conv_general_dilated(x, w, window_strides=(1, 1), padding="SAME",
                                     dimension_numbers=("NCHW", "OIHW", "NCHW"))
        return jax.nn.relu(y + b[None, :, None, None])

    def pool2x2(x):
        n, c, h, w = x.shape
        return x.reshape(n, c, h // 2, 2, w // 2, 2).max(axis=(3, 5))

    y = pool2x2(conv_same(x_nchw, params["conv1_w"], params["conv1_b"]))
    y = pool2x2(conv_same(y, params["conv2_w"], params["conv2_b"]))
    flat = y.reshape(B, C2 * HO * WO)                       # torch .view(-1, 64*2*3)
    mask = jnp.transpose(dropout_keep, (0, 2, 1)).reshape(B, C2 * HO * WO) * 2.0
    flat = flat * mask
    x1 = jax.nn.sigmoid(flat @ params["fc1_w"].T + params["fc1_b"])
    x2 = x1 @ params["fc2_w"].T + params["fc2_b"]
    return x2, x1


if __name__ == "__main__":
    key = jax.random.PRNGKey(0)
    pkey, xkey, dkey = jax.random.split(key, 3)

    params = init_params(pkey)           # torch-layout parameters
    kparams = prepare_params(params)     # one-time kernel-layout prep (hoisted out of the call path)

    x = jax.random.normal(xkey, (B, 1, H1, W1), jnp.float32)   # [2, 1, 8, 12] NCHW
    # TODO(synk): F.dropout's exact PyTorch RNG stream cannot be reproduced; this is a
    # statistically equivalent Bernoulli(0.5) inverted-dropout keep mask (training mode).
    dropout_keep = jax.random.bernoulli(dkey, 0.5, (B, HO * WO, C2)).astype(jnp.float32)

    x2, x1 = cnn_classifier_forward(kparams, x, dropout_keep)
    jax.block_until_ready((x2, x1))

    assert x2.shape == (B, NF2) and x2.dtype == jnp.float32
    assert x1.shape == (B, NF1) and x1.dtype == jnp.float32
    assert bool(jnp.all((x1 >= -1e-3) & (x1 <= 1.0 + 1e-2)))   # sigmoid range (approx recip)

    x2_ref, x1_ref = reference_forward(params, x, dropout_keep)
    assert jnp.allclose(x2, x2_ref, rtol=5e-2, atol=5e-2), \
        f"x2 mismatch: {float(jnp.max(jnp.abs(x2 - x2_ref)))}"
    assert jnp.allclose(x1, x1_ref, rtol=5e-2, atol=5e-2), \
        f"x1 mismatch: {float(jnp.max(jnp.abs(x1 - x1_ref)))}"

    print("KERNEL_OK")
</pallas_src>

<mosaic_0001>
module attributes {stable_mosaic.version = 11 : i64} {
  func.func @_cnn_fused_kernel(%arg0: memref<192x128xbf16, #tpu.memory_space<vmem>>, %arg1: memref<128x128xbf16, #tpu.memory_space<vmem>>, %arg2: memref<1x128xf32, #tpu.memory_space<vmem>>, %arg3: memref<1152x128xbf16, #tpu.memory_space<vmem>>, %arg4: memref<1x128xf32, #tpu.memory_space<vmem>>, %arg5: memref<120x192xbf16, #tpu.memory_space<vmem>>, %arg6: memref<48x96xbf16, #tpu.memory_space<vmem>>, %arg7: memref<48x128xf32, #tpu.memory_space<vmem>>, %arg8: memref<768x128xbf16, #tpu.memory_space<vmem>>, %arg9: memref<1x128xf32, #tpu.memory_space<vmem>>, %arg10: memref<128x128xf32, #tpu.memory_space<vmem>>, %arg11: memref<1x128xf32, #tpu.memory_space<vmem>>, %arg12: memref<8x128xf32, #tpu.memory_space<vmem>>, %arg13: memref<8x128xf32, #tpu.memory_space<vmem>>, %arg14: memref<208x128xf32, #tpu.memory_space<vmem>>, %arg15: memref<120x128xf32, #tpu.memory_space<vmem>>, %arg16: memref<112x128xf32, #tpu.memory_space<vmem>>) attributes {dimension_semantics = [], scalar_prefetch = 0 : i64, scratch_operands = 3 : i64, tpu.core_type = #tpu.core_type<tc>} {
    %c0 = arith.constant 0 : index
    %c0_0 = arith.constant 0 : index
    %0 = vector.load %arg0[%c0, %c0_0] : memref<192x128xbf16, #tpu.memory_space<vmem>>, vector<192x128xbf16>
    %c0_1 = arith.constant 0 : index
    %c0_2 = arith.constant 0 : index
    %1 = vector.load %arg1[%c0_1, %c0_2] : memref<128x128xbf16, #tpu.memory_space<vmem>>, vector<128x128xbf16>
    %cst = arith.constant dense<0.000000e+00> : vector<192x128xf32>
    %2 = tpu.matmul %0, %1, %cst {dimension_numbers = #tpu.dot_dimension_numbers<[1], [0], [0], [1], [0, 0, 1, 1], [], []>} : vector<192x128xbf16>, vector<128x128xbf16>, vector<192x128xf32> -> vector<192x128xf32>
    %c0_3 = arith.constant 0 : index
    %c0_4 = arith.constant 0 : index
    %3 = vector.load %arg2[%c0_3, %c0_4] : memref<1x128xf32, #tpu.memory_space<vmem>>, vector<1x128xf32>
    %4 = vector.broadcast %3 : vector<1x128xf32> to vector<192x128xf32>
    %5 = arith.addf %2, %4 : vector<192x128xf32>
    %cst_5 = arith.constant 0.000000e+00 : f32
    %6 = vector.broadcast %cst_5 : f32 to vector<192x128xf32>
    %7 = arith.maximumf %5, %6 : vector<192x128xf32>
    %c0_6 = arith.constant 0 : index
    %c0_7 = arith.constant 0 : index
    %8 = vector.load %arg14[%c0_6, %c0_7] : memref<208x128xf32, #tpu.memory_space<vmem>>, vector<192x128xf32>
    tpu.vector_store %arg14[%c0_6, %c0_7], %7 {strides = array<i32>} : memref<208x128xf32, #tpu.memory_space<vmem>>, vector<192x128xf32>,
    %cst_8 = arith.constant 0.000000e+00 : f32
    %9 = vector.broadcast %cst_8 : f32 to vector<16x128xf32>
    %c192 = arith.constant 192 : index
    %c0_9 = arith.constant 0 : index
    %10 = vector.load %arg14[%c192, %c0_9] : memref<208x128xf32, #tpu.memory_space<vmem>>, vector<16x128xf32>
    tpu.vector_store %arg14[%c192, %c0_9], %9 {strides = array<i32>} : memref<208x128xf32, #tpu.memory_space<vmem>>, vector<16x128xf32>,
    %c0_10 = arith.constant 0 : index
    %c0_11 = arith.constant 0 : index
    %11 = vector.load %arg14[%c0_10, %c0_11] : memref<208x128xf32, #tpu.memory_space<vmem>>, vector<192x128xf32>
    %c1 = arith.constant 1 : index
    %c0_12 = arith.constant 0 : index
    %12 = vector.load %arg14[%c1, %c0_12] : memref<208x128xf32, #tpu.memory_space<vmem>>, vector<192x128xf32>
    %13 = arith.maximumf %11, %12 : vector<192x128xf32>
    %c12 = arith.constant 12 : index
    %c0_13 = arith.constant 0 : index
    %14 = vector.load %arg14[%c12, %c0_13] : memref<208x128xf32, #tpu.memory_space<vmem>>, vector<192x128xf32>
    %c13 = arith.constant 13 : index
    %c0_14 = arith.constant 0 : index
    %15 = vector.load %arg14[%c13, %c0_14] : memref<208x128xf32, #tpu.memory_space<vmem>>, vector<192x128xf32>
    %16 = arith.maximumf %14, %15 : vector<192x128xf32>
    %17 = arith.maximumf %13, %16 : vector<192x128xf32>
    %c0_15 = arith.constant 0 : index
    %c0_16 = arith.constant 0 : index
    %18 = vector.load %arg5[%c0_15, %c0_16] : memref<120x192xbf16, #tpu.memory_space<vmem>>, vector<120x192xbf16>
    %19 = arith.truncf %17 : vector<192x128xf32> to vector<192x128xbf16>
    %cst_17 = arith.constant dense<0.000000e+00> : vector<120x128xf32>
    %20 = tpu.matmul %18, %19, %cst_17 {dimension_numbers = #tpu.dot_dimension_numbers<[1], [0], [0], [1], [0, 0, 1, 1], [], []>} : vector<120x192xbf16>, vector<192x128xbf16>, vector<120x128xf32> -> vector<120x128xf32>
    %c0_18 = arith.constant 0 : index
    %c0_19 = arith.constant 0 : index
    %21 = vector.load %arg15[%c0_18, %c0_19] : memref<120x128xf32, #tpu.memory_space<vmem>>, vector<120x128xf32>
    tpu.vector_store %arg15[%c0_18, %c0_19], %20 {strides = array<i32>} : memref<120x128xf32, #tpu.memory_space<vmem>>, vector<120x128xf32>,
    %c0_20 = arith.constant 0 : index
    %c0_21 = arith.constant 0 : index
    %22 = vector.load %arg15[%c0_20, %c0_21] : memref<120x128xf32, #tpu.memory_space<vmem>>, vector<96x128xf32>
    %23 = arith.truncf %22 : vector<96x128xf32> to vector<96x128xbf16>
    %c0_22 = arith.constant 0 : index
    %c0_23 = arith.constant 0 : index
    %24 = vector.load %arg3[%c0_22, %c0_23] : memref<1152x128xbf16, #tpu.memory_space<vmem>>, vector<128x128xbf16>
    %cst_24 = arith.constant dense<0.000000e+00> : vector<96x128xf32>
    %25 = tpu.matmul %23, %24, %cst_24 {dimension_numbers = #tpu.dot_dimension_numbers<[1], [0], [0], [1], [0, 0, 1, 1], [], []>} : vector<96x128xbf16>, vector<128x128xbf16>, vector<96x128xf32> -> vector<96x128xf32>
    %c1_25 = arith.constant 1 : index
    %c0_26 = arith.constant 0 : index
    %26 = vector.load %arg15[%c1_25, %c0_26] : memref<120x128xf32, #tpu.memory_space<vmem>>, vector<96x128xf32>
    %27 = arith.truncf %26 : vector<96x128xf32> to vector<96x128xbf16>
    %c128 = arith.constant 128 : index
    %c0_27 = arith.constant 0 : index
    %28 = vector.load %arg3[%c128, %c0_27] : memref<1152x128xbf16, #tpu.memory_space<vmem>>, vector<128x128xbf16>
    %cst_28 = arith.constant dense<0.000000e+00> : vector<96x128xf32>
    %29 = tpu.matmul %27, %28, %cst_28 {dimension_numbers = #tpu.dot_dimension_numbers<[1], [0], [0], [1], [0, 0, 1, 1], [], []>} : vector<96x128xbf16>, vector<128x128xbf16>, vector<96x128xf32> -> vector<96x128xf32>
    %30 = arith.addf %25, %29 : vector<96x128xf32>
    %c2 = arith.constant 2 : index
    %c0_29 = arith.constant 0 : index
    %31 = vector.load %arg15[%c2, %c0_29] : memref<120x128xf32, #tpu.memory_space<vmem>>, vector<96x128xf32>
    %32 = arith.truncf %31 : vector<96x128xf32> to vector<96x128xbf16>
    %c256 = arith.constant 256 : index
    %c0_30 = arith.constant 0 : index
    %33 = vector.load %arg3[%c256, %c0_30] : memref<1152x128xbf16, #tpu.memory_space<vmem>>, vector<128x128xbf16>
    %cst_31 = arith.constant dense<0.000000e+00> : vector<96x128xf32>
    %34 = tpu.matmul %32, %33, %cst_31 {dimension_numbers = #tpu.dot_dimension_numbers<[1], [0], [0], [1], [0, 0, 1, 1], [], []>} : vector<96x128xbf16>, vector<128x128xbf16>, vector<96x128xf32> -> vector<96x128xf32>
    %35 = arith.addf %30, %34 : vector<96x128xf32>
    %c8 = arith.constant 8 : index
    %c0_32 = arith.constant 0 : index
    %36 = vector.load %arg15[%c8, %c0_32] : memref<120x128xf32, #tpu.memory_space<vmem>>, vector<96x128xf32>
    %37 = arith.truncf %36 : vector<96x128xf32> to vector<96x128xbf16>
    %c384 = arith.constant 384 : index
    %c0_33 = arith.constant 0 : index
    %38 = vector.load %arg3[%c384, %c0_33] : memref<1152x128xbf16, #tpu.memory_space<vmem>>, vector<128x128xbf16>
    %cst_34 = arith.constant dense<0.000000e+00> : vector<96x128xf32>
    %39 = tpu.matmul %37, %38, %cst_34 {dimension_numbers = #tpu.dot_dimension_numbers<[1], [0], [0], [1], [0, 0, 1, 1], [], []>} : vector<96x128xbf16>, vector<128x128xbf16>, vector<96x128xf32> -> vector<96x128xf32>
    %40 = arith.addf %35, %39 : vector<96x128xf32>
    %c9 = arith.constant 9 : index
    %c0_35 = arith.constant 0 : index
    %41 = vector.load %arg15[%c9, %c0_35] : memref<120x128xf32, #tpu.memory_space<vmem>>, vector<96x128xf32>
    %42 = arith.truncf %41 : vector<96x128xf32> to vector<96x128xbf16>
    %c512 = arith.constant 512 : index
    %c0_36 = arith.constant 0 : index
    %43 = vector.load %arg3[%c512, %c0_36] : memref<1152x128xbf16, #tpu.memory_space<vmem>>, vector<128x128xbf16>
    %cst_37 = arith.constant dense<0.000000e+00> : vector<96x128xf32>
    %44 = tpu.matmul %42, %43, %cst_37 {dimension_numbers = #tpu.dot_dimension_numbers<[1], [0], [0], [1], [0, 0, 1, 1], [], []>} : vector<96x128xbf16>, vector<128x128xbf16>, vector<96x128xf32> -> vector<96x128xf32>
    %45 = arith.addf %40, %44 : vector<96x128xf32>
    %c10 = arith.constant 10 : index
    %c0_38 = arith.constant 0 : index
    %46 = vector.load %arg15[%c10, %c0_38] : memref<120x128xf32, #tpu.memory_space<vmem>>, vector<96x128xf32>
    %47 = arith.truncf %46 : vector<96x128xf32> to vector<96x128xbf16>
    %c640 = arith.constant 640 : index
    %c0_39 = arith.constant 0 : index
    %48 = vector.load %arg3[%c640, %c0_39] : memref<1152x128xbf16, #tpu.memory_space<vmem>>, vector<128x128xbf16>
    %cst_40 = arith.constant dense<0.000000e+00> : vector<96x128xf32>
    %49 = tpu.matmul %47, %48, %cst_40 {dimension_numbers = #tpu.dot_dimension_numbers<[1], [0], [0], [1], [0, 0, 1, 1], [], []>} : vector<96x128xbf16>, vector<128x128xbf16>, vector<96x128xf32> -> vector<96x128xf32>
    %50 = arith.addf %45, %49 : vector<96x128xf32>
    %c16 = arith.constant 16 : index
    %c0_41 = arith.constant 0 : index
    %51 = vector.load %arg15[%c16, %c0_41] : memref<120x128xf32, #tpu.memory_space<vmem>>, vector<96x128xf32>
    %52 = arith.truncf %51 : vector<96x128xf32> to vector<96x128xbf16>
    %c768 = arith.constant 768 : index
    %c0_42 = arith.constant 0 : index
    %53 = vector.load %arg3[%c768, %c0_42] : memref<1152x128xbf16, #tpu.memory_space<vmem>>, vector<128x128xbf16>
    %cst_43 = arith.constant dense<0.000000e+00> : vector<96x128xf32>
    %54 = tpu.matmul %52, %53, %cst_43 {dimension_numbers = #tpu.dot_dimension_numbers<[1], [0], [0], [1], [0, 0, 1, 1], [], []>} : vector<96x128xbf16>, vector<128x128xbf16>, vector<96x128xf32> -> vector<96x128xf32>
    %55 = arith.addf %50, %54 : vector<96x128xf32>
    %c17 = arith.constant 17 : index
    %c0_44 = arith.constant 0 : index
    %56 = vector.load %arg15[%c17, %c0_44] : memref<120x128xf32, #tpu.memory_space<vmem>>, vector<96x128xf32>
    %57 = arith.truncf %56 : vector<96x128xf32> to vector<96x128xbf16>
    %c896 = arith.constant 896 : index
    %c0_45 = arith.constant 0 : index
    %58 = vector.load %arg3[%c896, %c0_45] : memref<1152x128xbf16, #tpu.memory_space<vmem>>, vector<128x128xbf16>
    %cst_46 = arith.constant dense<0.000000e+00> : vector<96x128xf32>
    %59 = tpu.matmul %57, %58, %cst_46 {dimension_numbers = #tpu.dot_dimension_numbers<[1], [0], [0], [1], [0, 0, 1, 1], [], []>} : vector<96x128xbf16>, vector<128x128xbf16>, vector<96x128xf32> -> vector<96x128xf32>
    %60 = arith.addf %55, %59 : vector<96x128xf32>
    %c18 = arith.constant 18 : index
    %c0_47 = arith.constant 0 : index
    %61 = vector.load %arg15[%c18, %c0_47] : memref<120x128xf32, #tpu.memory_space<vmem>>, vector<96x128xf32>
    %62 = arith.truncf %61 : vector<96x128xf32> to vector<96x128xbf16>
    %c1024 = arith.constant 1024 : index
    %c0_48 = arith.constant 0 : index
    %63 = vector.load %arg3[%c1024, %c0_48] : memref<1152x128xbf16, #tpu.memory_space<vmem>>, vector<128x128xbf16>
    %cst_49 = arith.constant dense<0.000000e+00> : vector<96x128xf32>
    %64 = tpu.matmul %62, %63, %cst_49 {dimension_numbers = #tpu.dot_dimension_numbers<[1], [0], [0], [1], [0, 0, 1, 1], [], []>} : vector<96x128xbf16>, vector<128x128xbf16>, vector<96x128xf32> -> vector<96x128xf32>
    %65 = arith.addf %60, %64 : vector<96x128xf32>
    %c0_50 = arith.constant 0 : index
    %c0_51 = arith.constant 0 : index
    %66 = vector.load %arg4[%c0_50, %c0_51] : memref<1x128xf32, #tpu.memory_space<vmem>>, vector<1x128xf32>
    %67 = vector.broadcast %66 : vector<1x128xf32> to vector<96x128xf32>
    %68 = arith.addf %65, %67 : vector<96x128xf32>
    %cst_52 = arith.constant 0.000000e+00 : f32
    %69 = vector.broadcast %cst_52 : f32 to vector<96x128xf32>
    %70 = arith.maximumf %68, %69 : vector<96x128xf32>
    %c0_53 = arith.constant 0 : index
    %c0_54 = arith.constant 0 : index
    %71 = vector.load %arg16[%c0_53, %c0_54] : memref<112x128xf32, #tpu.memory_space<vmem>>, vector<96x128xf32>
    tpu.vector_store %arg16[%c0_53, %c0_54], %70 {strides = array<i32>} : memref<112x128xf32, #tpu.memory_space<vmem>>, vector<96x128xf32>,
    %cst_55 = arith.constant 0.000000e+00 : f32
    %72 = vector.broadcast %cst_55 : f32 to vector<16x128xf32>
    %c96 = arith.constant 96 : index
    %c0_56 = arith.constant 0 : index
    %73 = vector.load %arg16[%c96, %c0_56] : memref<112x128xf32, #tpu.memory_space<vmem>>, vector<16x128xf32>
    tpu.vector_store %arg16[%c96, %c0_56], %72 {strides = array<i32>} : memref<112x128xf32, #tpu.memory_space<vmem>>, vector<16x128xf32>,
    %c0_57 = arith.constant 0 : index
    %c0_58 = arith.constant 0 : index
    %74 = vector.load %arg16[%c0_57, %c0_58] : memref<112x128xf32, #tpu.memory_space<vmem>>, vector<96x128xf32>
    %c1_59 = arith.constant 1 : index
    %c0_60 = arith.constant 0 : index
    %75 = vector.load %arg16[%c1_59, %c0_60] : memref<112x128xf32, #tpu.memory_space<vmem>>, vector<96x128xf32>
    %76 = arith.maximumf %74, %75 : vector<96x128xf32>
    %c8_61 = arith.constant 8 : index
    %c0_62 = arith.constant 0 : index
    %77 = vector.load %arg16[%c8_61, %c0_62] : memref<112x128xf32, #tpu.memory_space<vmem>>, vector<96x128xf32>
    %c9_63 = arith.constant 9 : index
    %c0_64 = arith.constant 0 : index
    %78 = vector.load %arg16[%c9_63, %c0_64] : memref<112x128xf32, #tpu.memory_space<vmem>>, vector<96x128xf32>
    %79 = arith.maximumf %77, %78 : vector<96x128xf32>
    %80 = arith.maximumf %76, %79 : vector<96x128xf32>
    %c0_65 = arith.constant 0 : index
    %c0_66 = arith.constant 0 : index
    %81 = vector.load %arg6[%c0_65, %c0_66] : memref<48x96xbf16, #tpu.memory_space<vmem>>, vector<48x96xbf16>
    %82 = arith.truncf %80 : vector<96x128xf32> to vector<96x128xbf16>
    %cst_67 = arith.constant dense<0.000000e+00> : vector<48x128xf32>
    %83 = tpu.matmul %81, %82, %cst_67 {dimension_numbers = #tpu.dot_dimension_numbers<[1], [0], [0], [1], [0, 0, 1, 1], [], []>} : vector<48x96xbf16>, vector<96x128xbf16>, vector<48x128xf32> -> vector<48x128xf32>
    %c0_68 = arith.constant 0 : index
    %c0_69 = arith.constant 0 : index
    %84 = vector.load %arg7[%c0_68, %c0_69] : memref<48x128xf32, #tpu.memory_space<vmem>>, vector<48x128xf32>
    %85 = arith.mulf %83, %84 : vector<48x128xf32>
    %86 = arith.truncf %85 : vector<48x128xf32> to vector<48x128xbf16>
    %87 = vector.extract_strided_slice %86 {offsets = [0, 0], sizes = [8, 128], strides = [1, 1]} : vector<48x128xbf16> to vector<8x128xbf16>
    %c0_70 = arith.constant 0 : index
    %c0_71 = arith.constant 0 : index
    %88 = vector.load %arg8[%c0_70, %c0_71] : memref<768x128xbf16, #tpu.memory_space<vmem>>, vector<128x128xbf16>
    %cst_72 = arith.constant dense<0.000000e+00> : vector<8x128xf32>
    %89 = tpu.matmul %87, %88, %cst_72 {dimension_numbers = #tpu.dot_dimension_numbers<[1], [0], [0], [1], [0, 0, 1, 1], [], []>} : vector<8x128xbf16>, vector<128x128xbf16>, vector<8x128xf32> -> vector<8x128xf32>
    %90 = vector.extract_strided_slice %86 {offsets = [8, 0], sizes = [8, 128], strides = [1, 1]} : vector<48x128xbf16> to vector<8x128xbf16>
    %c128_73 = arith.constant 128 : index
    %c0_74 = arith.constant 0 : index
    %91 = vector.load %arg8[%c128_73, %c0_74] : memref<768x128xbf16, #tpu.memory_space<vmem>>, vector<128x128xbf16>
    %cst_75 = arith.constant dense<0.000000e+00> : vector<8x128xf32>
    %92 = tpu.matmul %90, %91, %cst_75 {dimension_numbers = #tpu.dot_dimension_numbers<[1], [0], [0], [1], [0, 0, 1, 1], [], []>} : vector<8x128xbf16>, vector<128x128xbf16>, vector<8x128xf32> -> vector<8x128xf32>
    %93 = arith.addf %89, %92 : vector<8x128xf32>
    %94 = vector.extract_strided_slice %86 {offsets = [16, 0], sizes = [8, 128], strides = [1, 1]} : vector<48x128xbf16> to vector<8x128xbf16>
    %c256_76 = arith.constant 256 : index
    %c0_77 = arith.constant 0 : index
    %95 = vector.load %arg8[%c256_76, %c0_77] : memref<768x128xbf16, #tpu.memory_space<vmem>>, vector<128x128xbf16>
    %cst_78 = arith.constant dense<0.000000e+00> : vector<8x128xf32>
    %96 = tpu.matmul %94, %95, %cst_78 {dimension_numbers = #tpu.dot_dimension_numbers<[1], [0], [0], [1], [0, 0, 1, 1], [], []>} : vector<8x128xbf16>, vector<128x128xbf16>, vector<8x128xf32> -> vector<8x128xf32>
    %97 = arith.addf %93, %96 : vector<8x128xf32>
    %98 = vector.extract_strided_slice %86 {offsets = [24, 0], sizes = [8, 128], strides = [1, 1]} : vector<48x128xbf16> to vector<8x128xbf16>
    %c384_79 = arith.constant 384 : index
    %c0_80 = arith.constant 0 : index
    %99 = vector.load %arg8[%c384_79, %c0_80] : memref<768x128xbf16, #tpu.memory_space<vmem>>, vector<128x128xbf16>
    %cst_81 = arith.constant dense<0.000000e+00> : vector<8x128xf32>
    %100 = tpu.matmul %98, %99, %cst_81 {dimension_numbers = #tpu.dot_dimension_numbers<[1], [0], [0], [1], [0, 0, 1, 1], [], []>} : vector<8x128xbf16>, vector<128x128xbf16>, vector<8x128xf32> -> vector<8x128xf32>
    %101 = arith.addf %97, %100 : vector<8x128xf32>
    %102 = vector.extract_strided_slice %86 {offsets = [32, 0], sizes = [8, 128], strides = [1, 1]} : vector<48x128xbf16> to vector<8x128xbf16>
    %c512_82 = arith.constant 512 : index
    %c0_83 = arith.constant 0 : index
    %103 = vector.load %arg8[%c512_82, %c0_83] : memref<768x128xbf16, #tpu.memory_space<vmem>>, vector<128x128xbf16>
    %cst_84 = arith.constant dense<0.000000e+00> : vector<8x128xf32>
    %104 = tpu.matmul %102, %103, %cst_84 {dimension_numbers = #tpu.dot_dimension_numbers<[1], [0], [0], [1], [0, 0, 1, 1], [], []>} : vector<8x128xbf16>, vector<128x128xbf16>, vector<8x128xf32> -> vector<8x128xf32>
    %105 = arith.addf %101, %104 : vector<8x128xf32>
    %106 = vector.extract_strided_slice %86 {offsets = [40, 0], sizes = [8, 128], strides = [1, 1]} : vector<48x128xbf16> to vector<8x128xbf16>
    %c640_85 = arith.constant 640 : index
    %c0_86 = arith.constant 0 : index
    %107 = vector.load %arg8[%c640_85, %c0_86] : memref<768x128xbf16, #tpu.memory_space<vmem>>, vector<128x128xbf16>
    %cst_87 = arith.constant dense<0.000000e+00> : vector<8x128xf32>
    %108 = tpu.matmul %106, %107, %cst_87 {dimension_numbers = #tpu.dot_dimension_numbers<[1], [0], [0], [1], [0, 0, 1, 1], [], []>} : vector<8x128xbf16>, vector<128x128xbf16>, vector<8x128xf32> -> vector<8x128xf32>
    %109 = arith.addf %105, %108 : vector<8x128xf32>
    %c0_88 = arith.constant 0 : index
    %c0_89 = arith.constant 0 : index
    %110 = vector.load %arg9[%c0_88, %c0_89] : memref<1x128xf32, #tpu.memory_space<vmem>>, vector<1x128xf32>
    %111 = vector.broadcast %110 : vector<1x128xf32> to vector<8x128xf32>
    %112 = arith.addf %109, %111 : vector<8x128xf32>
    %cst_90 = arith.constant 0.000000e+00 : f32
    %113 = vector.broadcast %cst_90 : f32 to vector<8x128xf32>
    %114 = arith.subf %113, %112 : vector<8x128xf32>
    %115 = math.exp %114 : vector<8x128xf32>
    %cst_91 = arith.constant 1.000000e+00 : f32
    %116 = vector.broadcast %cst_91 : f32 to vector<8x128xf32>
    %117 = arith.addf %116, %115 : vector<8x128xf32>
    %118 = tpu.reciprocal %117 {approx = true} : vector<8x128xf32> -> vector<8x128xf32>
    %c0_92 = arith.constant 0 : index
    %c0_93 = arith.constant 0 : index
    %119 = vector.load %arg13[%c0_92, %c0_93] : memref<8x128xf32, #tpu.memory_space<vmem>>, vector<8x128xf32>
    tpu.vector_store %arg13[%c0_92, %c0_93], %118 {strides = array<i32>} : memref<8x128xf32, #tpu.memory_space<vmem>>, vector<8x128xf32>,
    %c0_94 = arith.constant 0 : index
    %c0_95 = arith.constant 0 : index
    %120 = vector.load %arg10[%c0_94, %c0_95] : memref<128x128xf32, #tpu.memory_space<vmem>>, vector<128x128xf32>
    %cst_96 = arith.constant dense<0.000000e+00> : vector<8x128xf32>
    %121 = tpu.matmul %118, %120, %cst_96 {dimension_numbers = #tpu.dot_dimension_numbers<[1], [0], [0], [1], [0, 0, 1, 1], [], []>} : vector<8x128xf32>, vector<128x128xf32>, vector<8x128xf32> -> vector<8x128xf32>
    %c0_97 = arith.constant 0 : index
    %c0_98 = arith.constant 0 : index
    %122 = vector.load %arg11[%c0_97, %c0_98] : memref<1x128xf32, #tpu.memory_space<vmem>>, vector<1x128xf32>
    %123 = vector.broadcast %122 : vector<1x128xf32> to vector<8x128xf32>
    %124 = arith.addf %121, %123 : vector<8x128xf32>
    %c0_99 = arith.constant 0 : index
    %c0_100 = arith.constant 0 : index
    %125 = vector.load %arg12[%c0_99, %c0_100] : memref<8x128xf32, #tpu.memory_space<vmem>>, vector<8x128xf32>
    tpu.vector_store %arg12[%c0_99, %c0_100], %124 {strides = array<i32>} : memref<8x128xf32, #tpu.memory_space<vmem>>, vector<8x128xf32>,
    return
  }
}

</mosaic_0001>

<bundles_post_ra>
// kernel: cnn_classifier_forward.1
= control target key start
LH: loop header
LB: loop body
LE: loop exit
PB: predicated region body
PF: predicated region fallthrough
CT: control target
= control target key end

     0   :  { %19 = vsyncpa [#allocation6], 0  ;;  %s3450_s28 = smov [#allocation5]   ;;  %s3451_s30 = smov 64   ;;  %s4390_s0 = inlined_call_operand.vmem [shape: bf16[192,128], index: 0, kind: input, shape index: {}]   ;;  %s4391_s1 = inlined_call_operand.vmem [shape: bf16[128,128], index: 1, kind: input, shape index: {}]   ;;  %s4392_s2 = inlined_call_operand.vmem [shape: f32[1,128], index: 2, kind: input, shape index: {}]   ;;  %s4393_s3 = inlined_call_operand.hbm [shape: bf16[1152,128], index: 3, kind: input, shape index: {}]   ;;  %s4394_s4 = inlined_call_operand.vmem [shape: f32[1,128], index: 4, kind: input, shape index: {}]   ;;  %s4395_s5 = inlined_call_operand.vmem [shape: bf16[120,192], index: 5, kind: input, shape index: {}]   ;;  %s4396_s6 = inlined_call_operand.vmem [shape: bf16[48,96], index: 6, kind: input, shape index: {}]   ;;  %s4397_s7 = inlined_call_operand.vmem [shape: f32[48,128], index: 7, kind: input, shape index: {}]   ;;  %s4398_s8 = inlined_call_operand.vmem [shape: bf16[768,128], index: 8, kind: input, shape index: {}]   ;;  %s4399_s9 = inlined_call_operand.vmem [shape: f32[1,128], index: 9, kind: input, shape index: {}]   ;;  %s4400_s10 = inlined_call_operand.vmem [shape: f32[128,128], index: 10, kind: input, shape index: {}]   ;;  %s4401_s11 = inlined_call_operand.vmem [shape: f32[1,128], index: 11, kind: input, shape index: {}]   ;;  %s4402_s12 = inlined_call_operand.vmem [shape: f32[8,128], index: 12, kind: output, shape index: {0}]   ;;  %s4403_s13 = inlined_call_operand.vmem [shape: f32[8,128], index: 13, kind: output, shape index: {1}]  }
   0x1   :  { %s30_s27 = sshll.u32 %s4393_s3, 4  ;;  %s32_s29 = sshll.u32 %s3450_s28, 4  ;;  %s31_s27 = int_to_ptr.hbm [resolvable:$true] %s30_s27  ;;  %s33_s29 = int_to_ptr.vmem [resolvable:$true] %s32_s29 }
   0x2   :  { %s3452_s14 = smov 4  }
   0x3   :  { %38 = dma.hbm_to_vmem [thread:$0]  %s31_s27, 9216, %s33_s29, [#allocation6], %s3451_s30, %s3451_s30, %s3452_s14  }
   0x4   :  { %3448 = dma.done.wait [#allocation6], 9216  }
   0x5   :  { %3449 = vsyncadd [#allocation6], 4294958080  ;;  %v3273_v0 = vld [vmem:[%s4391_s1 + $0x38] sm:$0xff]  ;;  %v3272_v1 = vld [vmem:[%s4391_s1 + $0x30] sm:$0xff]  ;;  %vm607_vm0 = vcmask 523264   ;;  %vm2036_vm1 = vcmask 785408  }
   0x6   :  { %224 = vmatpush.bf16.msra.mxu0 %v3273_v0  ;;  %v3271_v2 = vld [vmem:[%s4391_s1 + $0x28] sm:$0xff]  ;;  %v3270_v3 = vld [vmem:[%s4391_s1 + $0x20] sm:$0xff]  ;;  %v3269_v4 = vld [vmem:[%s4391_s1 + $0x18] sm:$0xff] }
   0x7   :  { %v3268_v5 = vld [vmem:[%s4391_s1 + $0x10] sm:$0xff]  ;;  %v3267_v6 = vld [vmem:[%s4391_s1 + $0x8] sm:$0xff]  ;;  %v3266_v7 = vld [vmem:[%s4391_s1] sm:$0xff] }
   0x8   :  { %v3254_v8 = vld [vmem:[%s4390_s0] sm:$0xff]  ;;  %v3255_v9 = vld [vmem:[%s4390_s0 + $0x8] sm:$0xff]  ;;  %v3256_v10 = vld [vmem:[%s4390_s0 + $0x10] sm:$0xff] }
   0x9   :  { %v3257_v11 = vld [vmem:[%s4390_s0 + $0x18] sm:$0xff]  ;;  %v3258_v12 = vld [vmem:[%s4390_s0 + $0x20] sm:$0xff]  ;;  %v3259_v13 = vld [vmem:[%s4390_s0 + $0x28] sm:$0xff] }
   0xa   :  { %225 = vmatpush.bf16.msra.mxu0 %v3272_v1  ;;  %v3260_v14 = vld [vmem:[%s4390_s0 + $0x30] sm:$0xff]  ;;  %v3261_v15 = vld [vmem:[%s4390_s0 + $0x38] sm:$0xff]  ;;  %v3578_v16 = vld [vmem:[%s4392_s2] ss:$0 sm:$0xff] }
   0xb   :  { %v3262_v17 = vld [vmem:[%s4390_s0 + $0x40] sm:$0xff]  ;;  %v3263_v24 = vld [vmem:[%s4390_s0 + $0x48] sm:$0xff]  ;;  %v3264_v31 = vld [vmem:[%s4390_s0 + $0x50] sm:$0xff] }
   0xc   :  { %v3265_v51 = vld [vmem:[%s4390_s0 + $0x58] sm:$0xff] }
   0xe   :  { %226 = vmatpush.bf16.msra.mxu0 %v3271_v2 }
  0x12   :  { %227 = vmatpush.bf16.msra.mxu0 %v3270_v3 }
  0x16   :  { %228 = vmatpush.bf16.msra.mxu0 %v3269_v4 }
  0x1a   :  { %229 = vmatpush.bf16.msra.mxu0 %v3268_v5 }
  0x1e   :  { %230 = vmatpush.bf16.msra.mxu0 %v3267_v6 }
  0x22   :  { %231 = vmatpush.bf16.msra.mxu0 %v3266_v7 }
  0x25   :  { %232 = vmatmul.bf16.vlgmr.msra.gmra.mxu0 %v3254_v8 }
  0x35   :  { %237 = vmatmul.bf16.gmra.mxu0 %v3255_v9 }
  0x45   :  { %242 = vmatmul.bf16.gmra.mxu0 %v3256_v10 }
  0x55   :  { %247 = vmatmul.bf16.gmra.mxu0 %v3257_v11 }
  0x65   :  { %252 = vmatmul.bf16.gmra.mxu0 %v3258_v12 }
  0x75   :  { %257 = vmatmul.bf16.gmra.mxu0 %v3259_v13 }
  0x85   :  { %262 = vmatmul.bf16.gmra.mxu0 %v3260_v14 }
  0x95   :  { %267 = vmatmul.bf16.gmra.mxu0 %v3261_v15 }
  0xa2   :  { %v233_v18 = vpop.f32.mrf.mxu0 }
  0xa3   :  { %v234_v19 = vadd.f32 %v3578_v16, %v233_v18 }
  0xa5   :  { %v293_v20 = vmax.f32 %v234_v19, 0.0  ;;  %272 = vmatmul.bf16.gmra.mxu0 %v3262_v17 }
  0xa7   :  { %317 = vst [vmem:[#allocation2] sm:$0xff] %v293_v20 }
  0xaa   :  { %v235_v21 = vpop.f32.mrf.mxu0 }
  0xab   :  { %v236_v22 = vadd.f32 %v3578_v16, %v235_v21 }
  0xad   :  { %v294_v23 = vmax.f32 %v236_v22, 0.0 }
  0xaf   :  { %318 = vst [vmem:[#allocation2 + $0x8] sm:$0xff] %v294_v23 }
  0xb2   :  { %v238_v25 = vpop.f32.mrf.mxu0 }
  0xb3   :  { %v239_v26 = vadd.f32 %v3578_v16, %v238_v25 }
  0xb5   :  { %v295_v27 = vmax.f32 %v239_v26, 0.0  ;;  %277 = vmatmul.bf16.gmra.mxu0 %v3263_v24 }
  0xb6   :  { %v367_v36 = vld [vmem:[#allocation2 + $0x1] sm:$0xff] }
  0xb7   :  { %319 = vst [vmem:[#allocation2 + $0x10] sm:$0xff] %v295_v27  ;;  %v391_v42 = vmax.f32 %v293_v20, %v367_v36 }
  0xba   :  { %v240_v28 = vpop.f32.mrf.mxu0 }
  0xbb   :  { %v241_v29 = vadd.f32 %v3578_v16, %v240_v28 }
  0xbd   :  { %v296_v30 = vmax.f32 %v241_v29, 0.0 }
  0xbe   :  { %v415_v33 = vld [vmem:[#allocation2 + $0xc] sm:$0xff] }
  0xbf   :  { %320 = vst [vmem:[#allocation2 + $0x18] sm:$0xff] %v296_v30  ;;  %v439_v34 = vld [vmem:[#allocation2 + $0xd] sm:$0xff] }
  0xc0   :  { %v368_v37 = vld [vmem:[#allocation2 + $0x9] sm:$0xff]  ;;  %v463_v39 = vmax.f32 %v415_v33, %v439_v34 }
  0xc1   :  { %v392_v43 = vmax.f32 %v294_v23, %v368_v37 }
  0xc2   :  { %v243_v32 = vpop.f32.mrf.mxu0  ;;  %v3594_v45 = vmax.f32 %v391_v42, %v463_v39 }
  0xc3   :  { %v244_v35 = vadd.f32 %v3578_v16, %v243_v32 }
  0xc5   :  { %v297_v38 = vmax.f32 %v244_v35, 0.0  ;;  %282 = vmatmul.bf16.gmra.mxu0 %v3264_v31 }
  0xc6   :  { %v416_v40 = vld [vmem:[#allocation2 + $0x14] sm:$0xff] }
  0xc7   :  { %v440_v41 = vld [vmem:[#allocation2 + $0x15] sm:$0xff]  ;;  %321 = vst [vmem:[#allocation2 + $0x20] sm:$0xff] %v297_v38 }
  0xc8   :  { %v464_v44 = vmax.f32 %v416_v40, %v440_v41  ;;  %v369_v56 = vld [vmem:[#allocation2 + $0x11] sm:$0xff] }
  0xc9   :  { %v393_v62 = vmax.f32 %v295_v27, %v369_v56 }
  0xca   :  { %v3596_v46 = vmax.f32 %v392_v43, %v464_v44  ;;  %v245_v47 = vpop.f32.mrf.mxu0 }
  0xcb   :  { %v246_v48 = vadd.f32 %v3578_v16, %v245_v47 }
  0xcc   :  { %v526_v49 = vpack.c.bf16 %v3596_v46, %v3594_v45 }
  0xcd   :  { %v298_v50 = vmax.f32 %v246_v48, 0.0 }
  0xce   :  { %v417_v53 = vld [vmem:[#allocation2 + $0x1c] sm:$0xff] }
  0xcf   :  { %322 = vst [vmem:[#allocation2 + $0x28] sm:$0xff] %v298_v50  ;;  %v441_v54 = vld [vmem:[#allocation2 + $0x1d] sm:$0xff] }
  0xd0   :  { %v370_v57 = vld [vmem:[#allocation2 + $0x19] sm:$0xff]  ;;  %v465_v59 = vmax.f32 %v417_v53, %v441_v54 }
  0xd1   :  { %v394_v63 = vmax.f32 %v296_v30, %v370_v57 }
  0xd2   :  { %v248_v52 = vpop.f32.mrf.mxu0  ;;  %v3605_v1 = vmax.f32 %v393_v62, %v465_v59 }
  0xd3   :  { %v249_v55 = vadd.f32 %v3578_v16, %v248_v52 }
  0xd5   :  { %v299_v58 = vmax.f32 %v249_v55, 0.0  ;;  %287 = vmatmul.bf16.gmra.mxu0 %v3265_v51 }
  0xd6   :  { %v418_v60 = vld [vmem:[#allocation2 + $0x24] sm:$0xff] }
  0xd7   :  { %v442_v61 = vld [vmem:[#allocation2 + $0x25] sm:$0xff]  ;;  %323 = vst [vmem:[#allocation2 + $0x30] sm:$0xff] %v299_v58 }
  0xd8   :  { %v466_v0 = vmax.f32 %v418_v60, %v442_v61  ;;  %v371_v11 = vld [vmem:[#allocation2 + $0x21] sm:$0xff] }
  0xd9   :  { %v395_v18 = vmax.f32 %v297_v38, %v371_v11 }
  0xda   :  { %v3607_v2 = vmax.f32 %v394_v63, %v466_v0  ;;  %v250_v3 = vpop.f32.mrf.mxu0 }
  0xdb   :  { %v251_v4 = vadd.f32 %v3578_v16, %v250_v3 }
  0xdc   :  { %v527_v5 = vpack.c.bf16 %v3607_v2, %v3605_v1 }
  0xdd   :  { %v300_v6 = vmax.f32 %v251_v4, 0.0 }
  0xde   :  { %v419_v8 = vld [vmem:[#allocation2 + $0x2c] sm:$0xff] }
  0xdf   :  { %324 = vst [vmem:[#allocation2 + $0x38] sm:$0xff] %v300_v6  ;;  %v443_v9 = vld [vmem:[#allocation2 + $0x2d] sm:$0xff] }
  0xe0   :  { %v372_v12 = vld [vmem:[#allocation2 + $0x29] sm:$0xff]  ;;  %v467_v14 = vmax.f32 %v419_v8, %v443_v9 }
  0xe1   :  { %v396_v19 = vmax.f32 %v298_v50, %v372_v12 }
  0xe2   :  { %v253_v7 = vpop.f32.mrf.mxu0  ;;  %v3613_v21 = vmax.f32 %v395_v18, %v467_v14 }
  0xe3   :  { %v254_v10 = vadd.f32 %v3578_v16, %v253_v7 }
  0xe5   :  { %v301_v13 = vmax.f32 %v254_v10, 0.0 }
  0xe6   :  { %v420_v15 = vld [vmem:[#allocation2 + $0x34] sm:$0xff] }
  0xe7   :  { %v444_v17 = vld [vmem:[#allocation2 + $0x35] sm:$0xff]  ;;  %325 = vst [vmem:[#allocation2 + $0x40] sm:$0xff] %v301_v13 }
  0xe8   :  { %v468_v20 = vmax.f32 %v420_v15, %v444_v17  ;;  %v373_v31 = vld [vmem:[#allocation2 + $0x31] sm:$0xff] }
  0xe9   :  { %v397_v37 = vmax.f32 %v299_v58, %v373_v31 }
  0xea   :  { %v3615_v22 = vmax.f32 %v396_v19, %v468_v20  ;;  %v255_v23 = vpop.f32.mrf.mxu0 }
  0xeb   :  { %v256_v24 = vadd.f32 %v3578_v16, %v255_v23 }
  0xec   :  { %v528_v25 = vpack.c.bf16 %v3615_v22, %v3613_v21 }
  0xed   :  { %v302_v26 = vmax.f32 %v256_v24, 0.0 }
  0xee   :  { %v421_v28 = vld [vmem:[#allocation2 + $0x3c] sm:$0xff] }
  0xef   :  { %326 = vst [vmem:[#allocation2 + $0x48] sm:$0xff] %v302_v26  ;;  %v445_v29 = vld [vmem:[#allocation2 + $0x3d] sm:$0xff] }
  0xf0   :  { %v374_v32 = vld [vmem:[#allocation2 + $0x39] sm:$0xff]  ;;  %v469_v34 = vmax.f32 %v421_v28, %v445_v29 }
  0xf1   :  { %v398_v38 = vmax.f32 %v300_v6, %v374_v32 }
  0xf2   :  { %v258_v27 = vpop.f32.mrf.mxu0  ;;  %v3621_v40 = vmax.f32 %v397_v37, %v469_v34 }
  0xf3   :  { %v259_v30 = vadd.f32 %v3578_v16, %v258_v27 }
  0xf5   :  { %v303_v33 = vmax.f32 %v259_v30, 0.0 }
  0xf6   :  { %v422_v35 = vld [vmem:[#allocation2 + $0x44] sm:$0xff] }
  0xf7   :  { %v446_v36 = vld [vmem:[#allocation2 + $0x45] sm:$0xff]  ;;  %327 = vst [vmem:[#allocation2 + $0x50] sm:$0xff] %v303_v33 }
  0xf8   :  { %v470_v39 = vmax.f32 %v422_v35, %v446_v36  ;;  %v375_v53 = vld [vmem:[#allocation2 + $0x41] sm:$0xff] }
  0xf9   :  { %v399_v59 = vmax.f32 %v301_v13, %v375_v53 }
  0xfa   :  { %v3623_v41 = vmax.f32 %v398_v38, %v470_v39  ;;  %v260_v42 = vpop.f32.mrf.mxu0 }
  0xfb   :  { %v261_v43 = vadd.f32 %v3578_v16, %v260_v42 }
  0xfc   :  { %v529_v44 = vpack.c.bf16 %v3623_v41, %v3621_v40  ;;  %v3275_v40 = vld [vmem:[%s4395_s5 + $0x4] sm:$0xf0]  ;;  %v2705_v41 = vld [vmem:[%s4395_s5 + $0x10] sm:$0xf] }
  0xfd   :  { %v304_v47 = vmax.f32 %v261_v43, 0.0 }
  0xfe   :  { %v423_v50 = vld [vmem:[#allocation2 + $0x4c] sm:$0xff] }
  0xff   :  { %328 = vst [vmem:[#allocation2 + $0x58] sm:$0xff] %v304_v47  ;;  %v447_v51 = vld [vmem:[#allocation2 + $0x4d] sm:$0xff] }
 0x100   :  { %v376_v54 = vld [vmem:[#allocation2 + $0x49] sm:$0xff]  ;;  %v471_v56 = vmax.f32 %v423_v50, %v447_v51 }
 0x101   :  { %v400_v60 = vmax.f32 %v302_v26, %v376_v54 }
 0x102   :  { %v263_v48 = vpop.f32.mrf.mxu0  ;;  %v3634_v62 = vmax.f32 %v399_v59, %v471_v56 }
 0x103   :  { %v3629_v52 = vadd.f32 %v3578_v16, %v263_v48 }
 0x105   :  { %v305_v55 = vmax.f32 %v3629_v52, 0.0 }
 0x106   :  { %v424_v57 = vld [vmem:[#allocation2 + $0x54] sm:$0xff] }
 0x107   :  { %v448_v58 = vld [vmem:[#allocation2 + $0x55] sm:$0xff]  ;;  %329 = vst [vmem:[#allocation2 + $0x60] sm:$0xff] %v305_v55 }
 0x108   :  { %v472_v61 = vmax.f32 %v424_v57, %v448_v58  ;;  %v377_v11 = vld [vmem:[#allocation2 + $0x51] sm:$0xff] }
 0x109   :  { %v401_v18 = vmax.f32 %v303_v33, %v377_v11 }
 0x10a   :  { %v3636_v63 = vmax.f32 %v400_v60, %v472_v61  ;;  %v265_v0 = vpop.f32.mrf.mxu0 }
 0x10b   :  { %v266_v3 = vadd.f32 %v3578_v16, %v265_v0 }
 0x10c   :  { %v530_v4 = vpack.c.bf16 %v3636_v63, %v3634_v62 }
 0x10d   :  { %v306_v6 = vmax.f32 %v266_v3, 0.0 }
 0x10e   :  { %v425_v8 = vld [vmem:[#allocation2 + $0x5c] sm:$0xff] }
 0x10f   :  { %330 = vst [vmem:[#allocation2 + $0x68] sm:$0xff] %v306_v6  ;;  %v449_v9 = vld [vmem:[#allocation2 + $0x5d] sm:$0xff] }
 0x110   :  { %v378_v12 = vld [vmem:[#allocation2 + $0x59] sm:$0xff]  ;;  %v473_v14 = vmax.f32 %v425_v8, %v449_v9 }
 0x111   :  { %v402_v19 = vmax.f32 %v304_v47, %v378_v12 }
 0x112   :  { %v268_v7 = vpop.f32.mrf.mxu0  ;;  %v3642_v23 = vmax.f32 %v401_v18, %v473_v14 }
 0x113   :  { %v269_v10 = vadd.f32 %v3578_v16, %v268_v7 }
 0x115   :  { %v307_v13 = vmax.f32 %v269_v10, 0.0 }
 0x116   :  { %v426_v15 = vld [vmem:[#allocation2 + $0x64] sm:$0xff] }
 0x117   :  { %v450_v17 = vld [vmem:[#allocation2 + $0x65] sm:$0xff]  ;;  %331 = vst [vmem:[#allocation2 + $0x70] sm:$0xff] %v307_v13 }
 0x118   :  { %v474_v20 = vmax.f32 %v426_v15, %v450_v17  ;;  %v379_v3 = vld [vmem:[#allocation2 + $0x61] sm:$0xff] }
 0x119   :  { %v403_v15 = vmax.f32 %v305_v55, %v379_v3 }
 0x11a   :  { %v498_v24 = vmax.f32 %v402_v19, %v474_v20  ;;  %v270_v26 = vpop.f32.mrf.mxu0  ;;  %v3453_v20 = vmov 0.0  }
 0x11b   :  { %v271_v27 = vadd.f32 %v3578_v16, %v270_v26  ;;  %341 = vst [vmem:[#allocation2 + $0xc0] sm:$0xff] %v3453_v20 }
 0x11c   :  { %v531_v28 = vpack.c.bf16 %v498_v24, %v3642_v23  ;;  %342 = vst [vmem:[#allocation2 + $0xc8] sm:$0xff] %v3453_v20 }
 0x11d   :  { %v308_v29 = vmax.f32 %v271_v27, 0.0  ;;  %1956 = vst [vmem:[#allocation4 + $0x60] sm:$0xff] %v3453_v20 }
 0x11e   :  { %v380_v53 = vld [vmem:[#allocation2 + $0x69] sm:$0xff]  ;;  %1957 = vst [vmem:[#allocation4 + $0x68] sm:$0xff] %v3453_v20 }
 0x11f   :  { %332 = vst [vmem:[#allocation2 + $0x78] sm:$0xff] %v308_v29  ;;  %v427_v54 = vld [vmem:[#allocation2 + $0x6c] sm:$0xff]  ;;  %v404_v9 = vmax.f32 %v306_v6, %v380_v53 }
 0x120   :  { %v451_v58 = vld [vmem:[#allocation2 + $0x6d] sm:$0xff] }
 0x121   :  { %v475_v10 = vmax.f32 %v427_v54, %v451_v58 }
 0x122   :  { %v273_v30 = vpop.f32.mrf.mxu0 }
 0x123   :  { %v274_v31 = vadd.f32 %v3578_v16, %v273_v30  ;;  %v438_v2 = vld [vmem:[#allocation2 + $0xc4] sm:$0xff] }
 0x125   :  { %v309_v32 = vmax.f32 %v274_v31, 0.0 }
 0x126   :  { %v381_v42 = vld [vmem:[#allocation2 + $0x71] sm:$0xff] }
 0x127   :  { %333 = vst [vmem:[#allocation2 + $0x80] sm:$0xff] %v309_v32  ;;  %v428_v47 = vld [vmem:[#allocation2 + $0x74] sm:$0xff]  ;;  %v405_v59 = vmax.f32 %v307_v13, %v381_v42  ;;  %v499_v13 = vmax.f32 %v403_v15, %v475_v10 }
 0x128   :  { %v452_v48 = vld [vmem:[#allocation2 + $0x75] sm:$0xff] }
 0x129   :  { %v476_v0 = vmax.f32 %v428_v47, %v452_v48 }
 0x12a   :  { %v275_v34 = vpop.f32.mrf.mxu0 }
 0x12b   :  { %v276_v33 = vadd.f32 %v3578_v16, %v275_v34  ;;  %v500_v17 = vmax.f32 %v404_v9, %v476_v0 }
 0x12d   :  { %v310_v35 = vmax.f32 %v276_v33, 0.0  ;;  %v532_v19 = vpack.c.bf16 %v500_v17, %v499_v13 }
 0x12e   :  { %v429_v37 = vld [vmem:[#allocation2 + $0x7c] sm:$0xff] }
 0x12f   :  { %334 = vst [vmem:[#allocation2 + $0x88] sm:$0xff] %v310_v35  ;;  %v453_v38 = vld [vmem:[#allocation2 + $0x7d] sm:$0xff] }
 0x130   :  { %v382_v43 = vld [vmem:[#allocation2 + $0x79] sm:$0xff]  ;;  %v477_v51 = vmax.f32 %v429_v37, %v453_v38 }
 0x131   :  { %v406_v60 = vmax.f32 %v308_v29, %v382_v43 }
 0x132   :  { %v278_v36 = vpop.f32.mrf.mxu0  ;;  %v501_v7 = vmax.f32 %v405_v59, %v477_v51 }
 0x133   :  { %v3649_v39 = vadd.f32 %v3578_v16, %v278_v36 }
 0x135   :  { %v311_v50 = vmax.f32 %v3649_v39, 0.0  ;;  %v2699_v39 = vld [vmem:[%s4395_s5 + $0x8] sm:$0xf0] }
 0x136   :  { %v430_v56 = vld [vmem:[#allocation2 + $0x84] sm:$0xff] }
 0x137   :  { %v454_v57 = vld [vmem:[#allocation2 + $0x85] sm:$0xff]  ;;  %335 = vst [vmem:[#allocation2 + $0x90] sm:$0xff] %v311_v50 }
 0x138   :  { %v478_v61 = vmax.f32 %v430_v56, %v454_v57  ;;  %v383_v55 = vld [vmem:[#allocation2 + $0x81] sm:$0xff] }
 0x139   :  { %v407_v34 = vmax.f32 %v309_v32, %v383_v55  ;;  %v2697_v32 = vld [vmem:[%s4395_s5] sm:$0xf] }
 0x13a   :  { %v502_v8 = vmax.f32 %v406_v60, %v478_v61  ;;  %v280_v11 = vpop.f32.mrf.mxu0  ;;  %v2698_v21 = vor.u32 %v3275_v40, %v2697_v32 }
 0x13b   :  { %v3655_v12 = vadd.f32 %v3578_v16, %v280_v11 }
 0x13c   :  { %v533_v14 = vpack.c.bf16 %v502_v8, %v501_v7 }
 0x13d   :  { %v312_v18 = vmax.f32 %v3655_v12, 0.0  ;;  %v3274_v12 = vld [vmem:[%s4395_s5 + $0x4] sm:$0xf] }
 0x13e   :  { %632 = vmatpush.bf16.msra.mxu1 %v533_v14  ;;  %v431_v23 = vld [vmem:[#allocation2 + $0x8c] sm:$0xff] }
 0x13f   :  { %336 = vst [vmem:[#allocation2 + $0x98] sm:$0xff] %v312_v18  ;;  %v455_v24 = vld [vmem:[#allocation2 + $0x8d] sm:$0xff] }
 0x140   :  { %v384_v26 = vld [vmem:[#allocation2 + $0x89] sm:$0xff]  ;;  %v479_v29 = vmax.f32 %v431_v23, %v455_v24 }
 0x141   :  { %v408_v33 = vmax.f32 %v310_v35, %v384_v26 }
 0x142   :  { %633 = vmatpush.bf16.msra.mxu1 %v532_v19  ;;  %v283_v6 = vpop.f32.mrf.mxu0  ;;  %v3671_v37 = vmax.f32 %v407_v34, %v479_v29 }
 0x143   :  { %v3663_v52 = vadd.f32 %v3578_v16, %v283_v6 }
 0x145   :  { %v313_v27 = vmax.f32 %v3663_v52, 0.0  ;;  %v2713_v52 = vld [vmem:[%s4395_s5 + $0x20] sm:$0xf] }
 0x146   :  { %634 = vmatpush.bf16.msra.mxu1 %v531_v28  ;;  %v432_v30 = vld [vmem:[#allocation2 + $0x94] sm:$0xff] }
 0x147   :  { %v456_v31 = vld [vmem:[#allocation2 + $0x95] sm:$0xff]  ;;  %337 = vst [vmem:[#allocation2 + $0xa0] sm:$0xff] %v313_v27 }
 0x148   :  { %v480_v36 = vmax.f32 %v432_v30, %v456_v31  ;;  %v385_v23 = vld [vmem:[#allocation2 + $0x91] sm:$0xff] }
 0x149   :  { %v409_v30 = vmax.f32 %v311_v50, %v385_v23  ;;  %v3308_v23 = vld [vmem:[#allocation5 + $0xa0] sm:$0xff] }
 0x14a   :  { %635 = vmatpush.bf16.msra.mxu1 %v530_v4  ;;  %v3673_v38 = vmax.f32 %v408_v33, %v480_v36  ;;  %v285_v42 = vpop.f32.mrf.mxu0  ;;  %v2721_v36 = vld [vmem:[%s4395_s5 + $0x30] sm:$0xf] }
 0x14b   :  { %v286_v28 = vadd.f32 %v3578_v16, %v285_v42  ;;  %v3281_v42 = vld [vmem:[%s4395_s5 + $0x34] sm:$0xf0] }
 0x14c   :  { %v534_v43 = vpack.c.bf16 %v3673_v38, %v3671_v37  ;;  %v2707_v37 = vld [vmem:[%s4395_s5 + $0x18] sm:$0xf0]  ;;  %v2722_v38 = vor.u32 %v3281_v42, %v2721_v36  ;;  %v3305_v36 = vld [vmem:[#allocation5 + $0x88] sm:$0xff]  ;;  %v3323_v42 = vld [vmem:[#allocation5 + $0x118] sm:$0xff] }
 0x14d   :  { %v314_v47 = vmax.f32 %v286_v28, 0.0  ;;  %v3276_v28 = vld [vmem:[%s4395_s5 + $0x14] sm:$0xf] }
 0x14e   :  { %636 = vmatpush.bf16.msra.mxu1 %v529_v44  ;;  %v3277_v44 = vld [vmem:[%s4395_s5 + $0x14] sm:$0xf0]  ;;  %v433_v15 = vld [vmem:[#allocation2 + $0x9c] sm:$0xff] }
 0x14f   :  { %338 = vst [vmem:[#allocation2 + $0xa8] sm:$0xff] %v314_v47  ;;  %v2706_v61 = vor.u32 %v3277_v44, %v2705_v41  ;;  %v386_v14 = vld [vmem:[#allocation2 + $0x99] sm:$0xff]  ;;  %v3287_v44 = vld [vmem:[%s4395_s5 + $0x64] sm:$0xf0] }
 0x150   :  { %v457_v17 = vld [vmem:[#allocation2 + $0x9d] sm:$0xff]  ;;  %v410_v55 = vmax.f32 %v312_v18, %v386_v14  ;;  %v2702_v18 = vor.u32 %v3274_v12, %v2699_v39 }
 0x151   :  { %v481_v26 = vmax.f32 %v433_v15, %v457_v17  ;;  %v2745_v41 = vld [vmem:[%s4395_s5 + $0x60] sm:$0xf]  ;;  %v3324_v12 = vld [vmem:[#allocation5 + $0x120] sm:$0xff] }
 0x152   :  { %637 = vmatpush.bf16.msra.mxu1 %v528_v25  ;;  %v288_v62 = vpop.f32.mrf.mxu0  ;;  %v3301_v15 = vld [vmem:[#allocation5 + $0x68] sm:$0xff] }
 0x153   :  { %v289_v63 = vadd.f32 %v3578_v16, %v288_v62  ;;  %v505_v34 = vmax.f32 %v409_v30, %v481_v26  ;;  %v3283_v62 = vld [vmem:[%s4395_s5 + $0x44] sm:$0xf0]  ;;  %v3309_v17 = vld [vmem:[#allocation5 + $0xa8] sm:$0xff]  ;;  %v3299_v30 = vld [vmem:[#allocation5 + $0x58] sm:$0xff] }
 0x155   :  { %v315_v4 = vmax.f32 %v289_v63, 0.0  ;;  %v3278_v63 = vld [vmem:[%s4395_s5 + $0x24] sm:$0xf] }
 0x156   :  { %638 = vmatpush.bf16.msra.mxu1 %v527_v5  ;;  %v462_v5 = vld [vmem:[#allocation2 + $0xc5] sm:$0xff] }
 0x157   :  { %339 = vst [vmem:[#allocation2 + $0xb0] sm:$0xff] %v315_v4  ;;  %v486_v35 = vmax.f32 %v438_v2, %v462_v5  ;;  %v387_v3 = vld [vmem:[#allocation2 + $0xa1] sm:$0xff] }
 0x158   :  { %v434_v7 = vld [vmem:[#allocation2 + $0xa4] sm:$0xff]  ;;  %v411_v19 = vmax.f32 %v313_v27, %v387_v3 }
 0x159   :  { %v458_v8 = vld [vmem:[#allocation2 + $0xa5] sm:$0xff] }
 0x15a   :  { %639 = vmatpush.bf16.msra.mxu1 %v526_v49  ;;  %v290_v22 = vpop.f32.mrf.mxu0  ;;  %v482_v6 = vmax.f32 %v434_v7, %v458_v8  ;;  %v3279_v27 = vld [vmem:[%s4395_s5 + $0x24] sm:$0xf0]  ;;  %v3317_v8 = vld [vmem:[#allocation5 + $0xe8] sm:$0xff] }
 0x15b   :  { %v291_v25 = vadd.f32 %v3578_v16, %v290_v22  ;;  %v2714_v50 = vor.u32 %v3279_v27, %v2713_v52  ;;  %v3285_v22 = vld [vmem:[%s4395_s5 + $0x54] sm:$0xf0]  ;;  %v3298_v52 = vld [vmem:[#allocation5 + $0x50] sm:$0xff] }
 0x15c   :  { %v506_v31 = vmax.f32 %v410_v55, %v482_v6  ;;  %v3300_v6 = vld [vmem:[#allocation5 + $0x60] sm:$0xff]  ;;  %v3306_v27 = vld [vmem:[#allocation5 + $0x90] sm:$0xff] }
 0x15d   :  { %640 = vmatmul.bf16.vlgmr.msra.gmra.mxu1 %v2698_v21  ;;  %v316_v1 = vmax.f32 %v291_v25, 0.0  ;;  %v2737_v21 = vld [vmem:[%s4395_s5 + $0x50] sm:$0xf]  ;;  %v3280_v25 = vld [vmem:[%s4395_s5 + $0x34] sm:$0xf] }
 0x15e   :  { %v388_v45 = vld [vmem:[#allocation2 + $0xa9] sm:$0xff]  ;;  %v535_v33 = vpack.c.bf16 %v506_v31, %v505_v34  ;;  %v2738_v2 = vor.u32 %v3285_v22, %v2737_v21  ;;  %v3325_v34 = vld [vmem:[#allocation5 + $0x128] sm:$0xff] }
 0x15f   :  { %340 = vst [vmem:[#allocation2 + $0xb8] sm:$0xff] %v316_v1  ;;  %v435_v46 = vld [vmem:[#allocation2 + $0xac] sm:$0xff]  ;;  %v412_v10 = vmax.f32 %v314_v47, %v388_v45  ;;  %v2729_v47 = vld [vmem:[%s4395_s5 + $0x40] sm:$0xf] }
 0x160   :  { %v459_v49 = vld [vmem:[#allocation2 + $0xad] sm:$0xff]  ;;  %v2730_v32 = vor.u32 %v3283_v62, %v2729_v47  ;;  %v3321_v47 = vld [vmem:[#allocation5 + $0x108] sm:$0xff] }
 0x161   :  { %v483_v11 = vmax.f32 %v435_v46, %v459_v49  ;;  %v2731_v45 = vld [vmem:[%s4395_s5 + $0x48] sm:$0xf0]  ;;  %v2746_v46 = vor.u32 %v3287_v44, %v2745_v41  ;;  %v3307_v31 = vld [vmem:[#allocation5 + $0x98] sm:$0xff] }
 0x163   :  { %v507_v24 = vmax.f32 %v411_v19, %v483_v11  ;;  %v3316_v11 = vld [vmem:[#allocation5 + $0xe0] sm:$0xff]  ;;  %v3315_v19 = vld [vmem:[#allocation5 + $0xd8] sm:$0xff] }
 0x166   :  { %v389_v48 = vld [vmem:[#allocation2 + $0xb1] sm:$0xff]  ;;  %v390_v51 = vld [vmem:[#allocation2 + $0xb9] sm:$0xff] }
 0x167   :  { %v437_v16 = vld [vmem:[#allocation2 + $0xbc] sm:$0xff]  ;;  %v413_v53 = vmax.f32 %v315_v4, %v389_v48  ;;  %v414_v54 = vmax.f32 %v316_v1, %v390_v51  ;;  %v436_v57 = vld [vmem:[#allocation2 + $0xb4] sm:$0xff]  ;;  %v2715_v4 = vld [vmem:[%s4395_s5 + $0x28] sm:$0xf0] }
 0x168   :  { %v461_v56 = vld [vmem:[#allocation2 + $0xbd] sm:$0xff]  ;;  %v460_v58 = vld [vmem:[#allocation2 + $0xb5] sm:$0xff]  ;;  %v2718_v40 = vor.u32 %v3278_v63, %v2715_v4 }
 0x169   :  { %v485_v59 = vmax.f32 %v437_v16, %v461_v56  ;;  %v484_v60 = vmax.f32 %v436_v57, %v460_v58  ;;  %v510_v0 = vmax.f32 %v414_v54, %v486_v35  ;;  %v2723_v1 = vld [vmem:[%s4395_s5 + $0x38] sm:$0xf0]  ;;  %v3282_v35 = vld [vmem:[%s4395_s5 + $0x44] sm:$0xf]  ;;  %v3284_v48 = vld [vmem:[%s4395_s5 + $0x54] sm:$0xf] }
 0x16a   :  { %v2726_v5 = vor.u32 %v3280_v25, %v2723_v1  ;;  %v2734_v49 = vor.u32 %v3282_v35, %v2731_v45  ;;  %v2739_v51 = vld [vmem:[%s4395_s5 + $0x58] sm:$0xf0]  ;;  %v3303_v56 = vld [vmem:[#allocation5 + $0x78] sm:$0xff] }
 0x16b   :  { %v509_v9 = vmax.f32 %v413_v53, %v485_v59  ;;  %v508_v20 = vmax.f32 %v412_v10, %v484_v60  ;;  %v2742_v16 = vor.u32 %v3284_v48, %v2739_v51  ;;  %v525_v53 = vld [vmem:[%s4395_s5 + $0x70] sm:$0xff]  ;;  %859 = vmatpush.bf16.msra.mxu3 %v3303_v56  ;;  %v3286_v60 = vld [vmem:[%s4395_s5 + $0x64] sm:$0xf]  ;;  %v3310_v10 = vld [vmem:[#allocation5 + $0xb0] sm:$0xff] }
 0x16c   :  { %v581_v54 = vunpack.c.l.b16 %v525_v53  ;;  %v3311_v57 = vld [vmem:[#allocation5 + $0xb8] sm:$0xff]  ;;  %v3320_v63 = vld [vmem:[#allocation5 + $0x100] sm:$0xff] }
 0x16d   :  { %v537_v13 = vpack.c.bf16 %v510_v0, %v509_v9  ;;  %645 = vmatmul.bf16.gmra.mxu1 %v2706_v61  ;;  %v536_v29 = vpack.c.bf16 %v508_v20, %v507_v24  ;;  %v3319_v58 = vld [vmem:[#allocation5 + $0xf8] sm:$0xff]  ;;  %v2747_v61 = vld [vmem:[%s4395_s5 + $0x68] sm:$0xf0]  ;;  %v582_v20 = vunpack.c.h.b16 %v525_v53 }
 0x16e   :  { %v597_v59 = vpack.c.b16 %v581_v54, %v581_v54  ;;  %1200 = vmatpush.bf16.msrb.mxu1 %v3319_v58  ;;  %v3318_v0 = vld [vmem:[#allocation5 + $0xf0] sm:$0xff]  ;;  %v2750_v3 = vor.u32 %v3286_v60, %v2747_v61 }
 0x16f   :  { %684 = vmatpush.bf16.msra.mxu2 %v537_v13  ;;  %v3302_v9 = vld [vmem:[#allocation5 + $0x70] sm:$0xff]  ;;  %v3327_v13 = vld [vmem:[#allocation5 + $0x138] sm:$0xff]  ;;  %v598_v55 = vpack.c.b16 %v582_v20, %v582_v20 }
 0x170   :  { %860 = vmatpush.bf16.msra.mxu3 %v3302_v9  ;;  %1333 = vmatpush.bf16.msrb.mxu0 %v3327_v13  ;;  %v3326_v24 = vld [vmem:[#allocation5 + $0x130] sm:$0xff] }
 0x172   :  { %1201 = vmatpush.bf16.msrb.mxu1 %v3318_v0 }
 0x173   :  { %685 = vmatpush.bf16.msra.mxu2 %v536_v29  ;;  %v3314_v29 = vld [vmem:[#allocation5 + $0xd0] sm:$0xff] }
 0x174   :  { %861 = vmatpush.bf16.msra.mxu3 %v3301_v15  ;;  %1334 = vmatpush.bf16.msrb.mxu0 %v3326_v24 }
 0x176   :  { %1202 = vmatpush.bf16.msrb.mxu1 %v3317_v8 }
 0x177   :  { %686 = vmatpush.bf16.msra.mxu2 %v535_v33  ;;  %v3313_v33 = vld [vmem:[#allocation5 + $0xc8] sm:$0xff] }
 0x178   :  { %862 = vmatpush.bf16.msra.mxu3 %v3300_v6  ;;  %1335 = vmatpush.bf16.msrb.mxu0 %v3325_v34 }
 0x17a   :  { %1203 = vmatpush.bf16.msrb.mxu1 %v3316_v11 }
 0x17b   :  { %687 = vmatpush.bf16.msra.mxu2 %v534_v43  ;;  %v2710_v43 = vor.u32 %v3276_v28, %v2707_v37  ;;  %v3296_v28 = vld [vmem:[#allocation5 + $0x40] sm:$0xff] }
 0x17c   :  { %863 = vmatpush.bf16.msra.mxu3 %v3299_v30  ;;  %1336 = vmatpush.bf16.msrb.mxu0 %v3324_v12  ;;  %v3304_v37 = vld [vmem:[#allocation5 + $0x80] sm:$0xff] }
 0x17d   :  { %650 = vmatmul.bf16.gmra.mxu1 %v2714_v50  ;;  %v3312_v50 = vld [vmem:[#allocation5 + $0xc0] sm:$0xff] }
 0x17e   :  { %2751 = vmatmul.msk.bf16.vlgmr.msra.gmra.mxu2 %vm607_vm0, %v2702_v18  ;;  %1204 = vmatpush.bf16.msrb.mxu1 %v3315_v19  ;;  %v3297_v18 = vld [vmem:[#allocation5 + $0x48] sm:$0xff] }
 0x17f   :  { %1067 = vmatpush.bf16.msrb.mxu2 %v3311_v57 }
 0x180   :  { %864 = vmatpush.bf16.msra.mxu3 %v3298_v52  ;;  %1337 = vmatpush.bf16.msrb.mxu0 %v3323_v42  ;;  %v3349_v42 = vld [vmem:[#allocation5 + $0x1e8] sm:$0xff] }
 0x182   :  { %1205 = vmatpush.bf16.msrb.mxu1 %v3314_v29  ;;  %v3351_v29 = vld [vmem:[#allocation5 + $0x1f8] sm:$0xff] }
 0x183   :  { %1068 = vmatpush.bf16.msrb.mxu2 %v3310_v10 }
 0x184   :  { %865 = vmatpush.bf16.msra.mxu3 %v3297_v18  ;;  %v3295_v18 = vld [vmem:[#allocation5 + $0x38] sm:$0xff] }
 0x186   :  { %1206 = vmatpush.bf16.msrb.mxu1 %v3313_v33 }
 0x187   :  { %1069 = vmatpush.bf16.msrb.mxu2 %v3309_v17 }
 0x188   :  { %866 = vmatpush.bf16.msra.mxu3 %v3296_v28 }
 0x18a   :  { %1207 = vmatpush.bf16.msrb.mxu1 %v3312_v50 }
 0x18b   :  { %1070 = vmatpush.bf16.msrb.mxu2 %v3308_v23 }
 0x18c   :  { %946 = vmatpush.bf16.msrb.mxu3 %v3295_v18 }
 0x18d   :  { %655 = vmatmul.bf16.gmra.mxu1 %v2722_v38  ;;  %v3322_v38 = vld [vmem:[#allocation5 + $0x110] sm:$0xff] }
 0x18e   :  { %2752 = vmatmul.msk.bf16.gmra.mxu2 %vm607_vm0, %v2710_v43  ;;  %1338 = vmatpush.bf16.msrb.mxu0 %v3322_v38  ;;  %v3342_v38 = vld [vmem:[#allocation5 + $0x1b0] sm:$0xff] }
 0x18f   :  { %1071 = vmatpush.bf16.msrb.mxu2 %v3307_v31  ;;  %1732 = vmatpush.bf16.msra.mxu1 %v3351_v29  ;;  %v3350_v31 = vld [vmem:[#allocation5 + $0x1f0] sm:$0xff]  ;;  %v3344_v29 = vld [vmem:[#allocation5 + $0x1c0] sm:$0xff] }
 0x192   :  { %1339 = vmatpush.bf16.msrb.mxu0 %v3321_v47 }
 0x193   :  { %1072 = vmatpush.bf16.msrb.mxu2 %v3306_v27  ;;  %1733 = vmatpush.bf16.msra.mxu1 %v3350_v31 }
 0x196   :  { %1340 = vmatpush.bf16.msrb.mxu0 %v3320_v63 }
 0x197   :  { %1073 = vmatpush.bf16.msrb.mxu2 %v3305_v36  ;;  %v3343_v36 = vld [vmem:[#allocation5 + $0x1b8] sm:$0xff]  ;;  %1734 = vmatpush.bf16.msra.mxu1 %v3349_v42  ;;  %v3337_v42 = vld [vmem:[#allocation5 + $0x188] sm:$0xff] }
 0x19b   :  { %1074 = vmatpush.bf16.msrb.mxu2 %v3304_v37  ;;  %v3294_v37 = vld [vmem:[#allocation5 + $0x30] sm:$0xff] }
 0x19c   :  { %947 = vmatpush.bf16.msrb.mxu3 %v3294_v37  ;;  %v3336_v37 = vld [vmem:[#allocation5 + $0x180] sm:$0xff] }
 0x19d   :  { %660 = vmatmul.bf16.gmra.mxu1 %v2730_v32 }
 0x19e   :  { %2753 = vmatmul.msk.bf16.gmra.mxu2 %vm607_vm0, %v2718_v40 }
 0x19f   :  { %1599 = vmatpush.bf16.msra.mxu2 %v3343_v36  ;;  %v3289_v36 = vld [vmem:[#allocation5 + $0x8] sm:$0xff] }
 0x1a3   :  { %1600 = vmatpush.bf16.msra.mxu2 %v3342_v38 }
 0x1ad   :  { %665 = vmatmul.bf16.gmra.mxu1 %v2738_v2 }
 0x1ae   :  { %2754 = vmatmul.msk.bf16.gmra.mxu2 %vm607_vm0, %v2726_v5 }
 0x1bd   :  { %670 = vmatmul.bf16.gmra.mxu1 %v2746_v46 }
 0x1be   :  { %2755 = vmatmul.msk.bf16.gmra.mxu2 %vm607_vm0, %v2734_v49 }
 0x1cd   :  { %675 = vmatmul.bf16.gmra.mxu1 %v597_v59 }
 0x1ce   :  { %2756 = vmatmul.msk.bf16.gmra.mxu2 %vm607_vm0, %v2742_v16 }
 0x1da   :  { %v3794_v7 = vpop.f32.mrf.mxu1 }
 0x1de   :  { %2757 = vmatmul.msk.bf16.gmra.mxu2 %vm607_vm0, %v2750_v3 }
 0x1e2   :  { %v3797_v14 = vpop.f32.mrf.mxu1 }
 0x1ea   :  { %v646_v26 = vpop.f32.mrf.mxu1 }
 0x1ee   :  { %2758 = vmatmul.msk.bf16.gmra.mxu2 %vm607_vm0, %v598_v55 }
 0x1f2   :  { %v648_v39 = vpop.f32.mrf.mxu1 }
 0x1fa   :  { %v651_v43 = vpop.f32.mrf.mxu1 }
 0x201   :  { %v689_v62 = vpop.f32.mrf.mxu2 }
 0x202   :  { %v3801_v4 = vadd.f32 %v689_v62, %v3794_v7  ;;  %v653_v32 = vpop.f32.mrf.mxu1 }
 0x204   :  { %728 = vst [vmem:[#allocation3] sm:$0xff] %v3801_v4 }
 0x209   :  { %v691_v40 = vpop.f32.mrf.mxu2 }
 0x20a   :  { %v3805_v21 = vadd.f32 %v691_v40, %v3797_v14  ;;  %v656_v22 = vpop.f32.mrf.mxu1 }
 0x20c   :  { %729 = vst [vmem:[#allocation3 + $0x8] sm:$0xff] %v3805_v21  ;;  %v755_v25 = vpack.c.bf16 %v3805_v21, %v3801_v4 }
 0x211   :  { %v694_v1 = vpop.f32.mrf.mxu2 }
 0x212   :  { %v695_v2 = vadd.f32 %v694_v1, %v646_v26  ;;  %v658_v5 = vpop.f32.mrf.mxu1  ;;  %v3293_v1 = vld [vmem:[#allocation5 + $0x28] sm:$0xff] }
 0x213   :  { %v777_v45 = vld [vmem:[#allocation3 + $0x1] sm:$0xff]  ;;  %948 = vmatpush.bf16.msrb.mxu3 %v3293_v1 }
 0x214   :  { %730 = vst [vmem:[#allocation3 + $0x10] sm:$0xff] %v695_v2  ;;  %v1130_v41 = vpack.c.bf16 %v695_v2, %v3805_v21  ;;  %v985_v48 = vld [vmem:[#allocation3 + $0x2] sm:$0xff]  ;;  %v3334_v21 = vld [vmem:[#allocation5 + $0x170] sm:$0xff] }
 0x216   :  { %1208 = vmatmul.bf16.vlgmr.msrb.gmra.mxu1 %v1130_v41  ;;  %v3347_v41 = vld [vmem:[#allocation5 + $0x1d8] sm:$0xff] }
 0x219   :  { %v696_v44 = vpop.f32.mrf.mxu2 }
 0x21a   :  { %v697_v35 = vadd.f32 %v696_v44, %v648_v39  ;;  %v3811_v46 = vpop.f32.mrf.mxu1 }
 0x21b   :  { %v778_v49 = vld [vmem:[#allocation3 + $0x9] sm:$0xff] }
 0x21c   :  { %v3813_v51 = vld [vmem:[#allocation3 + $0xa] sm:$0xff]  ;;  %731 = vst [vmem:[#allocation3 + $0x18] sm:$0xff] %v697_v35  ;;  %v789_v16 = vpack.c.bf16 %v778_v49, %v777_v45  ;;  %v3816_v54 = vpack.c.bf16 %v697_v35, %v695_v2 }
 0x21d   :  { %v997_v53 = vpack.c.bf16 %v3813_v51, %v985_v48  ;;  %v3341_v2 = vld [vmem:[#allocation5 + $0x1a8] sm:$0xff]  ;;  %v3292_v45 = vld [vmem:[#allocation5 + $0x20] sm:$0xff] }
 0x21e   :  { %867 = vmatmul.bf16.vlgmr.msra.gmra.mxu3 %v789_v16  ;;  %1601 = vmatpush.bf16.msra.mxu2 %v3341_v2  ;;  %v3346_v16 = vld [vmem:[#allocation5 + $0x1d0] sm:$0xff] }
 0x21f   :  { %1075 = vmatmul.bf16.vlgmr.msrb.gmra.mxu2 %v997_v53  ;;  %949 = vmatpush.bf16.msrb.mxu3 %v3292_v45 }
 0x221   :  { %v699_v56 = vpop.f32.mrf.mxu2 }
 0x222   :  { %v700_v57 = vadd.f32 %v699_v56, %v651_v43  ;;  %v3818_v58 = vpop.f32.mrf.mxu1  ;;  %v3348_v43 = vld [vmem:[#allocation5 + $0x1e0] sm:$0xff] }
 0x223   :  { %v1252_v59 = vld [vmem:[#allocation3 + $0x11] sm:$0xff]  ;;  %1735 = vmatpush.bf16.msra.mxu1 %v3348_v43 }
 0x224   :  { %v3820_v60 = vld [vmem:[#allocation3 + $0x12] sm:$0xff]  ;;  %732 = vst [vmem:[#allocation3 + $0x20] sm:$0xff] %v700_v57  ;;  %v1263_v61 = vpack.c.bf16 %v1252_v59, %v778_v49  ;;  %v1131_v0 = vpack.c.bf16 %v700_v57, %v697_v35 }
 0x225   :  { %v1396_v3 = vpack.c.bf16 %v3820_v60, %v3813_v51  ;;  %v3358_v49 = vld [vmem:[#allocation5 + $0x230] sm:$0xff] }
 0x226   :  { %1341 = vmatmul.bf16.vlgmr.msrb.gmra.mxu0 %v1263_v61  ;;  %1213 = vmatmul.bf16.gmra.mxu1 %v1131_v0  ;;  %v3291_v0 = vld [vmem:[#allocation5 + $0x18] sm:$0xff]  ;;  %v3354_v43 = vld [vmem:[#allocation5 + $0x210] sm:$0xff] }
 0x227   :  { %1736 = vmatpush.bf16.msra.mxu1 %v3347_v41  ;;  %950 = vmatpush.bf16.msrb.mxu3 %v3291_v0  ;;  %v3353_v41 = vld [vmem:[#allocation5 + $0x208] sm:$0xff] }
 0x229   :  { %v701_v7 = vpop.f32.mrf.mxu2 }
 0x22a   :  { %v702_v8 = vadd.f32 %v701_v7, %v653_v32  ;;  %v3824_v9 = vpop.f32.mrf.mxu1  ;;  %v3339_v7 = vld [vmem:[#allocation5 + $0x198] sm:$0xff] }
 0x22b   :  { %v780_v10 = vld [vmem:[#allocation3 + $0x19] sm:$0xff]  ;;  %1737 = vmatpush.bf16.msra.mxu1 %v3346_v16 }
 0x22c   :  { %v3826_v11 = vld [vmem:[#allocation3 + $0x1a] sm:$0xff]  ;;  %733 = vst [vmem:[#allocation3 + $0x28] sm:$0xff] %v702_v8  ;;  %v3828_v14 = vpack.c.bf16 %v780_v10, %v1252_v59  ;;  %v3834_v17 = vpack.c.bf16 %v702_v8, %v700_v57 }
 0x22d   :  { %v3832_v15 = vpack.c.bf16 %v3826_v11, %v3820_v60 }
 0x22e   :  { %872 = vmatmul.bf16.gmra.mxu3 %v3828_v14 }
 0x22f   :  { %1080 = vmatmul.bf16.gmra.mxu2 %v3832_v15 }
 0x231   :  { %v704_v13 = vpop.f32.mrf.mxu2 }
 0x232   :  { %v705_v19 = vadd.f32 %v704_v13, %v656_v22  ;;  %v3840_v23 = vpop.f32.mrf.mxu1 }
 0x233   :  { %v1254_v20 = vld [vmem:[#allocation3 + $0x21] sm:$0xff] }
 0x234   :  { %v3838_v6 = vld [vmem:[#allocation3 + $0x22] sm:$0xff]  ;;  %734 = vst [vmem:[#allocation3 + $0x30] sm:$0xff] %v705_v19  ;;  %v1264_v24 = vpack.c.bf16 %v1254_v20, %v780_v10  ;;  %v1132_v55 = vpack.c.bf16 %v705_v19, %v702_v8  ;;  %v3345_v8 = vld [vmem:[#allocation5 + $0x1c8] sm:$0xff] }
 0x235   :  { %v1397_v26 = vpack.c.bf16 %v3838_v6, %v3826_v11  ;;  %1738 = vmatpush.bf16.msra.mxu1 %v3345_v8 }
 0x236   :  { %1346 = vmatmul.bf16.gmra.mxu0 %v1264_v24  ;;  %1218 = vmatmul.bf16.gmra.mxu1 %v1132_v55  ;;  %v3356_v24 = vld [vmem:[#allocation5 + $0x220] sm:$0xff] }
 0x239   :  { %v706_v30 = vpop.f32.mrf.mxu2  ;;  %1739 = vmatpush.bf16.msra.mxu1 %v3344_v29 }
 0x23a   :  { %v707_v34 = vadd.f32 %v706_v30, %v658_v5  ;;  %v3854_v50 = vpop.f32.mrf.mxu1  ;;  %v3359_v5 = vld [vmem:[#allocation5 + $0x238] sm:$0xff] }
 0x23b   :  { %v782_v33 = vld [vmem:[#allocation3 + $0x29] sm:$0xff]  ;;  %1865 = vmatpush.bf16.msra.mxu0 %v3359_v5 }
 0x23c   :  { %v3844_v52 = vld [vmem:[#allocation3 + $0x2a] sm:$0xff]  ;;  %735 = vst [vmem:[#allocation3 + $0x38] sm:$0xff] %v707_v34  ;;  %v3846_v27 = vpack.c.bf16 %v782_v33, %v1254_v20  ;;  %v3852_v39 = vpack.c.bf16 %v707_v34, %v705_v19  ;;  %v3290_v19 = vld [vmem:[#allocation5 + $0x10] sm:$0xff] }
 0x23d   :  { %v3850_v12 = vpack.c.bf16 %v3844_v52, %v3838_v6  ;;  %v3338_v20 = vld [vmem:[#allocation5 + $0x190] sm:$0xff]  ;;  %951 = vmatpush.bf16.msrb.mxu3 %v3290_v19 }
 0x23e   :  { %877 = vmatmul.bf16.gmra.mxu3 %v3846_v27 }
 0x23f   :  { %1085 = vmatmul.bf16.gmra.mxu2 %v3850_v12  ;;  %1866 = vmatpush.bf16.msra.mxu0 %v3358_v49 }
 0x241   :  { %v709_v28 = vpop.f32.mrf.mxu2  ;;  %952 = vmatpush.bf16.msrb.mxu3 %v3289_v36 }
 0x242   :  { %v710_v47 = vadd.f32 %v709_v28, %v3811_v46  ;;  %v3863_v44 = vpop.f32.mrf.mxu1  ;;  %v3340_v46 = vld [vmem:[#allocation5 + $0x1a0] sm:$0xff]  ;;  %v3355_v28 = vld [vmem:[#allocation5 + $0x218] sm:$0xff] }
 0x243   :  { %v1256_v62 = vld [vmem:[#allocation3 + $0x31] sm:$0xff]  ;;  %1602 = vmatpush.bf16.msra.mxu2 %v3340_v46 }
 0x244   :  { %v3859_v63 = vld [vmem:[#allocation3 + $0x32] sm:$0xff]  ;;  %736 = vst [vmem:[#allocation3 + $0x40] sm:$0xff] %v710_v47  ;;  %v1265_v32 = vpack.c.bf16 %v1256_v62, %v782_v33  ;;  %v1133_v40 = vpack.c.bf16 %v710_v47, %v707_v34 }
 0x245   :  { %v1398_v22 = vpack.c.bf16 %v3859_v63, %v3844_v52 }
 0x246   :  { %1351 = vmatmul.bf16.gmra.mxu0 %v1265_v32  ;;  %1223 = vmatmul.bf16.gmra.mxu1 %v1133_v40 }
 0x247   :  { %1603 = vmatpush.bf16.msra.mxu2 %v3339_v7 }
 0x249   :  { %v711_v35 = vpop.f32.mrf.mxu2 }
 0x24a   :  { %v712_v48 = vadd.f32 %v711_v35, %v3818_v58  ;;  %v3357_v58 = vld [vmem:[#allocation5 + $0x228] sm:$0xff]  ;;  %v3878_v10 = vpop.f32.mrf.mxu1 }
 0x24b   :  { %v784_v53 = vld [vmem:[#allocation3 + $0x39] sm:$0xff]  ;;  %1867 = vmatpush.bf16.msra.mxu0 %v3357_v58  ;;  %1604 = vmatpush.bf16.msra.mxu2 %v3338_v20 }
 0x24c   :  { %v3866_v56 = vld [vmem:[#allocation3 + $0x3a] sm:$0xff]  ;;  %737 = vst [vmem:[#allocation3 + $0x48] sm:$0xff] %v712_v48  ;;  %v3868_v57 = vpack.c.bf16 %v784_v53, %v1256_v62  ;;  %v3874_v61 = vpack.c.bf16 %v712_v48, %v710_v47 }
 0x24d   :  { %v3872_v59 = vpack.c.bf16 %v3866_v56, %v3859_v63 }
 0x24e   :  { %882 = vmatmul.bf16.gmra.mxu3 %v3868_v57 }
 0x24f   :  { %1090 = vmatmul.bf16.gmra.mxu2 %v3872_v59  ;;  %1868 = vmatpush.bf16.msra.mxu0 %v3356_v24 }
 0x250   :  { %1605 = vmatpush.bf16.msra.mxu2 %v3337_v42 }
 0x251   :  { %v714_v13 = vpop.f32.mrf.mxu2 }
 0x252   :  { %v715_v55 = vadd.f32 %v714_v13, %v3824_v9  ;;  %v3288_v9 = vld [vmem:[#allocation5] sm:$0xff]  ;;  %v678_v38 = vpop.f32.mrf.mxu1 }
 0x253   :  { %v1258_v30 = vld [vmem:[#allocation3 + $0x41] sm:$0xff]  ;;  %1869 = vmatpush.bf16.msra.mxu0 %v3355_v28  ;;  %953 = vmatpush.bf16.msrb.mxu3 %v3288_v9 }
 0x254   :  { %v3881_v31 = vld [vmem:[#allocation3 + $0x42] sm:$0xff]  ;;  %738 = vst [vmem:[#allocation3 + $0x50] sm:$0xff] %v715_v55  ;;  %v1266_v34 = vpack.c.bf16 %v1258_v30, %v784_v53  ;;  %v1134_v33 = vpack.c.bf16 %v715_v55, %v712_v48  ;;  %1606 = vmatpush.bf16.msra.mxu2 %v3336_v37 }
 0x255   :  { %v1399_v18 = vpack.c.bf16 %v3881_v31, %v3866_v56 }
 0x256   :  { %1356 = vmatmul.bf16.gmra.mxu0 %v1266_v34  ;;  %1228 = vmatmul.bf16.gmra.mxu1 %v1134_v33 }
 0x257   :  { %1870 = vmatpush.bf16.msra.mxu0 %v3354_v43 }
 0x259   :  { %v716_v47 = vpop.f32.mrf.mxu2 }
 0x25a   :  { %v717_v62 = vadd.f32 %v716_v47, %v3840_v23  ;;  %v3352_v23 = vld [vmem:[#allocation5 + $0x200] sm:$0xff] }
 0x25b   :  { %v786_v32 = vld [vmem:[#allocation3 + $0x49] sm:$0xff]  ;;  %1871 = vmatpush.bf16.msra.mxu0 %v3353_v41 }
 0x25c   :  { %v3886_v40 = vld [vmem:[#allocation3 + $0x4a] sm:$0xff]  ;;  %739 = vst [vmem:[#allocation3 + $0x58] sm:$0xff] %v717_v62  ;;  %v793_v1 = vpack.c.bf16 %v786_v32, %v1258_v30  ;;  %v3892_v5 = vpack.c.bf16 %v717_v62, %v715_v55 }
 0x25d   :  { %v3890_v2 = vpack.c.bf16 %v3886_v40, %v3881_v31 }
 0x25e   :  { %887 = vmatmul.bf16.gmra.mxu3 %v793_v1 }
 0x25f   :  { %1095 = vmatmul.bf16.gmra.mxu2 %v3890_v2  ;;  %1872 = vmatpush.bf16.msra.mxu0 %v3352_v23 }
 0x261   :  { %v719_v35 = vpop.f32.mrf.mxu2 }
 0x262   :  { %v3896_v45 = vadd.f32 %v719_v35, %v3854_v50 }
 0x263   :  { %v1260_v46 = vld [vmem:[#allocation3 + $0x51] sm:$0xff] }
 0x264   :  { %v3898_v49 = vld [vmem:[#allocation3 + $0x52] sm:$0xff]  ;;  %740 = vst [vmem:[#allocation3 + $0x60] sm:$0xff] %v3896_v45  ;;  %v1267_v48 = vpack.c.bf16 %v1260_v46, %v786_v32  ;;  %v1135_v16 = vpack.c.bf16 %v3896_v45, %v717_v62 }
 0x265   :  { %v1400_v53 = vpack.c.bf16 %v3898_v49, %v3886_v40 }
 0x266   :  { %1361 = vmatmul.bf16.gmra.mxu0 %v1267_v48  ;;  %1233 = vmatmul.bf16.gmra.mxu1 %v1135_v16 }
 0x269   :  { %v721_v0 = vpop.f32.mrf.mxu2 }
 0x26a   :  { %v3905_v7 = vadd.f32 %v721_v0, %v3863_v44 }
 0x26b   :  { %v788_v50 = vld [vmem:[#allocation3 + $0x59] sm:$0xff] }
 0x26c   :  { %v3907_v58 = vld [vmem:[#allocation3 + $0x5a] sm:$0xff]  ;;  %741 = vst [vmem:[#allocation3 + $0x68] sm:$0xff] %v3905_v7  ;;  %v794_v8 = vpack.c.bf16 %v788_v50, %v1260_v46  ;;  %v1534_v19 = vpack.c.bf16 %v3905_v7, %v3896_v45 }
 0x26d   :  { %v1002_v13 = vpack.c.bf16 %v3907_v58, %v3898_v49 }
 0x26e   :  { %892 = vmatmul.bf16.gmra.mxu3 %v794_v8 }
 0x26f   :  { %1100 = vmatmul.bf16.gmra.mxu2 %v1002_v13 }
 0x271   :  { %v724_v20 = vpop.f32.mrf.mxu2 }
 0x272   :  { %v725_v24 = vadd.f32 %v724_v20, %v3878_v10  ;;  %v3328_v10 = vld [vmem:[#allocation5 + $0x140] sm:$0xff] }
 0x273   :  { %v1262_v55 = vld [vmem:[#allocation3 + $0x61] sm:$0xff] }
 0x274   :  { %v3915_v44 = vld [vmem:[#allocation3 + $0x62] sm:$0xff]  ;;  %742 = vst [vmem:[#allocation3 + $0x70] sm:$0xff] %v725_v24  ;;  %v1268_v29 = vpack.c.bf16 %v1262_v55, %v788_v50 }
 0x275   :  { %v1401_v30 = vpack.c.bf16 %v3915_v44, %v3907_v58 }
 0x276   :  { %1366 = vmatmul.bf16.gmra.mxu0 %v1268_v29  ;;  %1740 = vmatmul.bf16.vlgmr.msra.gmra.mxu1 %v3828_v14  ;;  %v3335_v14 = vld [vmem:[#allocation5 + $0x178] sm:$0xff] }
 0x277   :  { %1466 = vmatpush.bf16.msra.mxu3 %v3335_v14 }
 0x279   :  { %v726_v34 = vpop.f32.mrf.mxu2 }
 0x27b   :  { %1467 = vmatpush.bf16.msra.mxu3 %v3334_v21  ;;  %v1661_v33 = vld [vmem:[#allocation3 + $0x69] sm:$0xff] }
 0x27c   :  { %v1667_v36 = vpack.c.bf16 %v1661_v33, %v1262_v55  ;;  %v1794_v9 = vld [vmem:[#allocation3 + $0x6a] sm:$0xff] }
 0x27d   :  { %v1800_v37 = vpack.c.bf16 %v1794_v9, %v3915_v44 }
 0x27e   :  { %954 = vmatmul.bf16.vlgmr.msrb.gmra.mxu3 %v755_v25  ;;  %v3333_v25 = vld [vmem:[#allocation5 + $0x168] sm:$0xff] }
 0x27f   :  { %1607 = vmatmul.bf16.vlgmr.msra.gmra.mxu2 %v3816_v54  ;;  %1468 = vmatpush.bf16.msra.mxu3 %v3333_v25 }
 0x286   :  { %1873 = vmatmul.bf16.vlgmr.msra.gmra.mxu0 %v3832_v15  ;;  %1745 = vmatmul.bf16.gmra.mxu1 %v3846_v27  ;;  %v3332_v15 = vld [vmem:[#allocation5 + $0x160] sm:$0xff]  ;;  %v3331_v27 = vld [vmem:[#allocation5 + $0x158] sm:$0xff] }
 0x287   :  { %1469 = vmatpush.bf16.msra.mxu3 %v3332_v15 }
 0x28b   :  { %1470 = vmatpush.bf16.msra.mxu3 %v3331_v27 }
 0x28e   :  { %959 = vmatmul.bf16.gmra.mxu3 %v3816_v54 }
 0x28f   :  { %1612 = vmatmul.bf16.gmra.mxu2 %v3834_v17 }
 0x296   :  { %1878 = vmatmul.bf16.gmra.mxu0 %v3850_v12  ;;  %1750 = vmatmul.bf16.gmra.mxu1 %v3868_v57  ;;  %v3330_v12 = vld [vmem:[#allocation5 + $0x150] sm:$0xff]  ;;  %v3329_v57 = vld [vmem:[#allocation5 + $0x148] sm:$0xff] }
 0x297   :  { %1471 = vmatpush.bf16.msra.mxu3 %v3330_v12 }
 0x29b   :  { %1472 = vmatpush.bf16.msra.mxu3 %v3329_v57 }
 0x29e   :  { %964 = vmatmul.bf16.gmra.mxu3 %v3834_v17 }
 0x29f   :  { %1617 = vmatmul.bf16.gmra.mxu2 %v3852_v39  ;;  %1473 = vmatpush.bf16.msra.mxu3 %v3328_v10 }
 0x2a1   :  { %v3932_v4 = vpop.f32.mrf.mxu3 }
 0x2a2   :  { %v3954_v38 = vpop.f32.mrf.mxu2 }
 0x2a3   :  { %v3958_v43 = vpop.f32.mrf.mxu0 }
 0x2a6   :  { %1883 = vmatmul.bf16.gmra.mxu0 %v3872_v59  ;;  %1755 = vmatmul.bf16.gmra.mxu1 %v793_v1 }
 0x2a9   :  { %v3935_v54 = vpop.f32.mrf.mxu3 }
 0x2aa   :  { %v3965_v62 = vpop.f32.mrf.mxu2 }
 0x2ae   :  { %969 = vmatmul.bf16.gmra.mxu3 %v3852_v39 }
 0x2af   :  { %1622 = vmatmul.bf16.gmra.mxu2 %v3874_v61 }
 0x2b1   :  { %v3939_v17 = vpop.f32.mrf.mxu3 }
 0x2b6   :  { %1888 = vmatmul.bf16.gmra.mxu0 %v3890_v2  ;;  %1760 = vmatmul.bf16.gmra.mxu1 %v794_v8  ;;  %v3971_v2 = vpop.f32.mrf.mxu0 }
 0x2b9   :  { %v3942_v59 = vpop.f32.mrf.mxu3 }
 0x2be   :  { %974 = vmatmul.bf16.gmra.mxu3 %v3874_v61  ;;  %v3956_v61 = vpop.f32.mrf.mxu1  ;;  %v3979_v35 = vpop.f32.mrf.mxu0 }
 0x2bf   :  { %1627 = vmatmul.bf16.gmra.mxu2 %v3892_v5 }
 0x2c1   :  { %v3946_v39 = vpop.f32.mrf.mxu3 }
 0x2c6   :  { %1893 = vmatmul.bf16.gmra.mxu0 %v1002_v13  ;;  %1765 = vmatmul.bf16.gmra.mxu1 %v1667_v36  ;;  %v3967_v32 = vpop.f32.mrf.mxu1  ;;  %v3990_v45 = vpop.f32.mrf.mxu0 }
 0x2c9   :  { %v3948_v42 = vpop.f32.mrf.mxu3 }
 0x2ce   :  { %979 = vmatmul.bf16.gmra.mxu3 %v3892_v5  ;;  %v3973_v5 = vpop.f32.mrf.mxu2  ;;  %v3977_v23 = vpop.f32.mrf.mxu1 }
 0x2cf   :  { %1632 = vmatmul.bf16.gmra.mxu2 %v1534_v19  ;;  %v4001_v11 = vpop.f32.mrf.mxu0 }
 0x2d1   :  { %v3951_v28 = vpop.f32.mrf.mxu3 }
 0x2d6   :  { %1898 = vmatmul.bf16.gmra.mxu0 %v1800_v37  ;;  %v3986_v60 = vpop.f32.mrf.mxu2 }
 0x2d7   :  { %v4007_v50 = vpop.f32.mrf.mxu0 }
 0x2d9   :  { %v3960_v47 = vpop.f32.mrf.mxu3 }
 0x2de   :  { %1474 = vmatmul.bf16.vlgmr.msra.gmra.mxu3 %v1396_v3  ;;  %v3988_v3 = vpop.f32.mrf.mxu1  ;;  %v3994_v48 = vpop.f32.mrf.mxu2 }
 0x2e1   :  { %v3969_v1 = vpop.f32.mrf.mxu3 }
 0x2e6   :  { %v3999_v16 = vpop.f32.mrf.mxu1 }
 0x2e9   :  { %v3975_v41 = vpop.f32.mrf.mxu3 }
 0x2ee   :  { %1479 = vmatmul.bf16.gmra.mxu3 %v1397_v26  ;;  %v4003_v26 = vpop.f32.mrf.mxu2  ;;  %v4005_v0 = vpop.f32.mrf.mxu1 }
 0x2f1   :  { %v3984_v51 = vpop.f32.mrf.mxu3 }
 0x2f2   :  { %4404 = vst [vmem:[#allocation8_spill] sm:$0xff] %v3984_v51 }
 0x2f6   :  { %v4012_v8 = vpop.f32.mrf.mxu2  ;;  %v4014_v63 = vpop.f32.mrf.mxu1 }
 0x2f9   :  { %v3992_v46 = vpop.f32.mrf.mxu3 }
 0x2fa   :  { %4405 = vst [vmem:[#allocation9_spill] sm:$0xff] %v3992_v46 }
 0x2fe   :  { %1484 = vmatmul.bf16.gmra.mxu3 %v1398_v22  ;;  %v4016_v22 = vpop.f32.mrf.mxu0  ;;  %v4018_v19 = vpop.f32.mrf.mxu2 }
 0x2ff   :  { %v4020_v20 = vpop.f32.mrf.mxu1 }
 0x301   :  { %v955_v6 = vpop.f32.mrf.mxu3 }
 0x302   :  { %v956_v9 = vadd.f32 %v955_v6, %v3932_v4 }
 0x306   :  { %v4025_v24 = vpop.f32.mrf.mxu0  ;;  %v4029_v31 = vpop.f32.mrf.mxu2 }
 0x309   :  { %v957_v7 = vpop.f32.mrf.mxu3 }
 0x30e   :  { %1489 = vmatmul.bf16.gmra.mxu3 %v1399_v18  ;;  %v4031_v18 = vpop.f32.mrf.mxu1  ;;  %v4033_v55 = vpop.f32.mrf.mxu0 }
 0x30f   :  { %4406 = vst [vmem:[#allocation10_spill] sm:$0xff] %v4033_v55  ;;  %v4040_v34 = vpop.f32.mrf.mxu2 }
 0x311   :  { %v960_v52 = vpop.f32.mrf.mxu3 }
 0x312   :  { %v961_v4 = vadd.f32 %v960_v52, %v3939_v17 }
 0x316   :  { %v4042_v40 = vpop.f32.mrf.mxu1 }
 0x317   :  { %4407 = vst [vmem:[#allocation11_spill] sm:$0xff] %v4042_v40  ;;  %v4048_v14 = vpop.f32.mrf.mxu2 }
 0x318   :  { %4409 = vst [vmem:[#allocation13_spill] sm:$0xff] %v4048_v14 }
 0x319   :  { %v962_v13 = vpop.f32.mrf.mxu3 }
 0x31a   :  { %v963_v52 = vadd.f32 %v962_v13, %v3942_v59 }
 0x31e   :  { %1494 = vmatmul.bf16.gmra.mxu3 %v1400_v53  ;;  %v4046_v53 = vpop.f32.mrf.mxu0  ;;  %v4052_v25 = vpop.f32.mrf.mxu1 }
 0x31f   :  { %4408 = vst [vmem:[#allocation12_spill] sm:$0xff] %v4046_v53  ;;  %v4058_v58 = vpop.f32.mrf.mxu2 }
 0x320   :  { %4410 = vst [vmem:[#allocation14_spill] sm:$0xff] %v4052_v25 }
 0x321   :  { %v4027_v56 = vpop.f32.mrf.mxu3  ;;  %4412 = vst [vmem:[#allocation16_spill] sm:$0xff] %v4058_v58 }
 0x322   :  { %v966_v59 = vadd.f32 %v4027_v56, %v3946_v39 }
 0x326   :  { %v4054_v15 = vpop.f32.mrf.mxu0  ;;  %v4060_v44 = vpop.f32.mrf.mxu1 }
 0x327   :  { %4411 = vst [vmem:[#allocation15_spill] sm:$0xff] %v4054_v15  ;;  %v1608_v57 = vpop.f32.mrf.mxu2  ;;  %v1106_v15 = vadd.f32 %v3954_v38, %v956_v9 }
 0x328   :  { %4413 = vst [vmem:[#allocation17_spill] sm:$0xff] %v4060_v44  ;;  %v958_v44 = vadd.f32 %v957_v7, %v3935_v54  ;;  %v4081_v54 = vld [vmem:[%s4394_s4] ss:$0 sm:$0xff] }
 0x329   :  { %v4035_v29 = vpop.f32.mrf.mxu3 }
 0x32a   :  { %v1107_v53 = vadd.f32 %v3965_v62, %v958_v44  ;;  %v968_v39 = vadd.f32 %v4035_v29, %v3948_v42 }
 0x32c   :  { %v1240_v38 = vadd.f32 %v3967_v32, %v1107_v53 }
 0x32e   :  { %1499 = vmatmul.bf16.gmra.mxu3 %v1401_v30  ;;  %v4062_v30 = vpop.f32.mrf.mxu0  ;;  %v1741_v10 = vpop.f32.mrf.mxu1 }
 0x32f   :  { %4414 = vst [vmem:[#allocation18_spill] sm:$0xff] %v4062_v30  ;;  %v1610_v37 = vpop.f32.mrf.mxu2  ;;  %v1239_v30 = vadd.f32 %v3956_v61, %v1106_v15  ;;  %v1108_v61 = vadd.f32 %v3973_v5, %v961_v4  ;;  %v1109_v5 = vadd.f32 %v3986_v60, %v963_v52  ;;  %v1110_v60 = vadd.f32 %v3994_v48, %v966_v59 }
 0x330   :  { %v1111_v48 = vadd.f32 %v4003_v26, %v968_v39 }
 0x331   :  { %v4044_v49 = vpop.f32.mrf.mxu3  ;;  %v1372_v14 = vadd.f32 %v3958_v43, %v1239_v30  ;;  %v1373_v43 = vadd.f32 %v3971_v2, %v1240_v38  ;;  %v1241_v15 = vadd.f32 %v3977_v23, %v1108_v61  ;;  %v1242_v23 = vadd.f32 %v3988_v3, %v1109_v5 }
 0x332   :  { %v1243_v3 = vadd.f32 %v3999_v16, %v1110_v60  ;;  %v971_v42 = vadd.f32 %v4044_v49, %v3951_v28 }
 0x333   :  { %v1374_v2 = vadd.f32 %v3979_v35, %v1241_v15  ;;  %v1375_v35 = vadd.f32 %v3990_v45, %v1242_v23 }
 0x334   :  { %v1376_v45 = vadd.f32 %v4001_v11, %v1243_v3  ;;  %v1112_v11 = vadd.f32 %v4012_v8, %v971_v42 }
 0x336   :  { %v1874_v33 = vpop.f32.mrf.mxu0  ;;  %v1743_v25 = vpop.f32.mrf.mxu1 }
 0x337   :  { %v1613_v40 = vpop.f32.mrf.mxu2 }
 0x339   :  { %v4050_v21 = vpop.f32.mrf.mxu3 }
 0x33e   :  { %v1876_v58 = vpop.f32.mrf.mxu0  ;;  %v1746_v55 = vpop.f32.mrf.mxu1 }
 0x33f   :  { %v1615_v17 = vpop.f32.mrf.mxu2 }
 0x341   :  { %v4056_v27 = vpop.f32.mrf.mxu3 }
 0x346   :  { %v1879_v9 = vpop.f32.mrf.mxu0  ;;  %v1748_v44 = vpop.f32.mrf.mxu1 }
 0x347   :  { %v1618_v4 = vpop.f32.mrf.mxu2 }
 0x349   :  { %v4064_v12 = vpop.f32.mrf.mxu3 }
 0x351   :  { %v4066_v36 = vpop.f32.mrf.mxu3 }
 0x352   :  { %4415 = vst [vmem:[#allocation19_spill] sm:$0xff] %v4066_v36 }
 0x359   :  { %v4070_v46 = vpop.f32.mrf.mxu3 }
 0x35a   :  { %4416 = vst [vmem:[#allocation20_spill] sm:$0xff] %v4070_v46 }
 0x361   :  { %v1475_v51 = vpop.f32.mrf.mxu3 }
 0x362   :  { %v1505_v36 = vadd.f32 %v1475_v51, %v1372_v14 }
 0x364   :  { %v1638_v6 = vadd.f32 %v1608_v57, %v1505_v36  ;;  %v1881_v57 = vpop.f32.mrf.mxu0 }
 0x366   :  { %v1771_v46 = vadd.f32 %v1741_v10, %v1638_v6  ;;  %v1751_v6 = vpop.f32.mrf.mxu1 }
 0x368   :  { %v1904_v62 = vadd.f32 %v1874_v33, %v1771_v46 }
 0x369   :  { %v1477_v7 = vpop.f32.mrf.mxu3 }
 0x36a   :  { %v1920_v51 = vadd.f32 %v4081_v54, %v1904_v62  ;;  %v1506_v14 = vadd.f32 %v1477_v7, %v1373_v43  ;;  %v1620_v7 = vpop.f32.mrf.mxu2 }
 0x36c   :  { %v1932_v32 = vmax.f32 %v1920_v51, 0.0  ;;  %v1639_v53 = vadd.f32 %v1610_v37, %v1506_v14  ;;  %v1884_v38 = vpop.f32.mrf.mxu0 }
 0x36e   :  { %1944 = vst [vmem:[#allocation4] sm:$0xff] %v1932_v32  ;;  %v1772_v30 = vadd.f32 %v1743_v25, %v1639_v53  ;;  %v1753_v51 = vpop.f32.mrf.mxu1 }
 0x370   :  { %v1905_v46 = vadd.f32 %v1876_v58, %v1772_v30 }
 0x371   :  { %v1480_v10 = vpop.f32.mrf.mxu3 }
 0x372   :  { %v1921_v33 = vadd.f32 %v4081_v54, %v1905_v46  ;;  %v1507_v36 = vadd.f32 %v1480_v10, %v1374_v2 }
 0x374   :  { %v1933_v13 = vmax.f32 %v1921_v33, 0.0  ;;  %v1640_v37 = vadd.f32 %v1613_v40, %v1507_v36  ;;  %v1886_v15 = vpop.f32.mrf.mxu0  ;;  %v1623_v33 = vpop.f32.mrf.mxu2 }
 0x376   :  { %1945 = vst [vmem:[#allocation4 + $0x8] sm:$0xff] %v1933_v13  ;;  %v1773_v25 = vadd.f32 %v1746_v55, %v1640_v37  ;;  %v1756_v49 = vpop.f32.mrf.mxu1 }
 0x378   :  { %v1906_v58 = vadd.f32 %v1879_v9, %v1773_v25 }
 0x379   :  { %v1482_v61 = vpop.f32.mrf.mxu3 }
 0x37a   :  { %v1922_v62 = vadd.f32 %v4081_v54, %v1906_v58  ;;  %v1508_v43 = vadd.f32 %v1482_v61, %v1375_v35 }
 0x37c   :  { %v1934_v56 = vmax.f32 %v1922_v62, 0.0  ;;  %v1641_v40 = vadd.f32 %v1615_v17, %v1508_v43  ;;  %v1244_v17 = vadd.f32 %v4005_v0, %v1111_v48  ;;  %v973_v0 = vadd.f32 %v4050_v21, %v3960_v47  ;;  %v1625_v21 = vpop.f32.mrf.mxu2 }
 0x37d   :  { %v1970_v30 = vld [vmem:[#allocation4 + $0x1] sm:$0xff] }
 0x37e   :  { %1946 = vst [vmem:[#allocation4 + $0x10] sm:$0xff] %v1934_v56  ;;  %v1774_v55 = vadd.f32 %v1748_v44, %v1641_v40  ;;  %v1377_v2 = vadd.f32 %v4007_v50, %v1244_v17  ;;  %v1113_v50 = vadd.f32 %v4018_v19, %v973_v0  ;;  %v4421_v0 = vld [vmem:[#allocation13_spill] sm:$0xff] }
 0x380   :  { %v1907_v9 = vadd.f32 %v1881_v57, %v1774_v55  ;;  %v1982_v57 = vmax.f32 %v1932_v32, %v1970_v30  ;;  %v1245_v32 = vadd.f32 %v4014_v63, %v1112_v11  ;;  %v976_v63 = vadd.f32 %v4056_v27, %v3969_v1  ;;  %v4419_v11 = vld [vmem:[#allocation19_spill] sm:$0xff] }
 0x381   :  { %v1485_v14 = vpop.f32.mrf.mxu3  ;;  %v1246_v39 = vadd.f32 %v4020_v20, %v1113_v50  ;;  %v978_v27 = vadd.f32 %v4064_v12, %v3975_v41 }
 0x382   :  { %v1923_v52 = vadd.f32 %v4081_v54, %v1907_v9  ;;  %v1509_v53 = vadd.f32 %v1485_v14, %v1376_v45  ;;  %v1378_v60 = vadd.f32 %v4016_v22, %v1245_v32  ;;  %v1114_v55 = vadd.f32 %v4029_v31, %v976_v63  ;;  %v4422_v32 = vld [vmem:[#allocation12_spill] sm:$0xff]  ;;  %v4425_v63 = vld [vmem:[#allocation14_spill] sm:$0xff] }
 0x383   :  { %v1379_v48 = vadd.f32 %v4025_v24, %v1246_v39  ;;  %v1115_v24 = vadd.f32 %v4040_v34, %v978_v27 }
 0x384   :  { %v1935_v29 = vmax.f32 %v1923_v52, 0.0  ;;  %v1642_v16 = vadd.f32 %v1618_v4, %v1509_v53  ;;  %v1247_v52 = vadd.f32 %v4031_v18, %v1114_v55  ;;  %v1628_v53 = vpop.f32.mrf.mxu2  ;;  %v4418_v18 = vld [vmem:[#allocation8_spill] sm:$0xff] }
 0x385   :  { %v1971_v44 = vld [vmem:[#allocation4 + $0x9] sm:$0xff] }
 0x386   :  { %1947 = vst [vmem:[#allocation4 + $0x18] sm:$0xff] %v1935_v29  ;;  %v1775_v26 = vadd.f32 %v1751_v6, %v1642_v16  ;;  %v1983_v5 = vmax.f32 %v1933_v13, %v1971_v44  ;;  %v1889_v13 = vpop.f32.mrf.mxu0  ;;  %v4417_v16 = vld [vmem:[#allocation10_spill] sm:$0xff] }
 0x387   :  { %v1380_v17 = vadd.f32 %v4417_v16, %v1247_v52 }
 0x388   :  { %v1908_v46 = vadd.f32 %v1884_v38, %v1775_v26  ;;  %v1997_v10 = vmax.f32 %v1982_v57, %v1983_v5 }
 0x389   :  { %v1487_v36 = vpop.f32.mrf.mxu3 }
 0x38a   :  { %v1924_v59 = vadd.f32 %v4081_v54, %v1908_v46  ;;  %v1510_v28 = vadd.f32 %v1487_v36, %v1377_v2  ;;  %v981_v46 = vadd.f32 %v4419_v11, %v4418_v18 }
 0x38c   :  { %v1936_v37 = vmax.f32 %v1924_v59, 0.0  ;;  %v1643_v23 = vadd.f32 %v1620_v7, %v1510_v28 }
 0x38d   :  { %v1972_v4 = vld [vmem:[#allocation4 + $0x11] sm:$0xff] }
 0x38e   :  { %1948 = vst [vmem:[#allocation4 + $0x20] sm:$0xff] %v1936_v37  ;;  %v1776_v8 = vadd.f32 %v1753_v51, %v1643_v23  ;;  %v1984_v25 = vmax.f32 %v1934_v56, %v1972_v4  ;;  %v1758_v56 = vpop.f32.mrf.mxu1  ;;  %v1891_v3 = vpop.f32.mrf.mxu0 }
 0x390   :  { %v1909_v6 = vadd.f32 %v1886_v15, %v1776_v8  ;;  %v1998_v58 = vmax.f32 %v1983_v5, %v1984_v25 }
 0x391   :  { %v1490_v35 = vpop.f32.mrf.mxu3 }
 0x392   :  { %v1925_v38 = vadd.f32 %v4081_v54, %v1909_v6  ;;  %v1511_v61 = vadd.f32 %v1490_v35, %v1378_v60  ;;  %v4115_v47 = vpack.c.bf16 %v1998_v58, %v1997_v10  ;;  %v4423_v58 = vld [vmem:[#allocation9_spill] sm:$0xff]  ;;  %v4424_v35 = vld [vmem:[#allocation20_spill] sm:$0xff] }
 0x394   :  { %v1937_v62 = vmax.f32 %v1925_v38, 0.0  ;;  %v1644_v43 = vadd.f32 %v1623_v33, %v1511_v61  ;;  %v4420_v33 = vld [vmem:[#allocation11_spill] sm:$0xff]  ;;  %v983_v38 = vadd.f32 %v4424_v35, %v4423_v58 }
 0x395   :  { %v1973_v19 = vld [vmem:[#allocation4 + $0x19] sm:$0xff]  ;;  %v1248_v34 = vadd.f32 %v4420_v33, %v1115_v24 }
 0x396   :  { %1949 = vst [vmem:[#allocation4 + $0x28] sm:$0xff] %v1937_v62  ;;  %v1777_v40 = vadd.f32 %v1756_v49, %v1644_v43  ;;  %v1985_v22 = vmax.f32 %v1935_v29, %v1973_v19  ;;  %v1761_v42 = vpop.f32.mrf.mxu1  ;;  %v1894_v26 = vpop.f32.mrf.mxu0  ;;  %v4426_v19 = vld [vmem:[#allocation16_spill] sm:$0xff] }
 0x397   :  { %v1630_v49 = vpop.f32.mrf.mxu2 }
 0x398   :  { %v1910_v7 = vadd.f32 %v1889_v13, %v1777_v40  ;;  %v1999_v9 = vmax.f32 %v1984_v25, %v1985_v22  ;;  %v1381_v13 = vadd.f32 %v4422_v32, %v1248_v34  ;;  %v1117_v40 = vadd.f32 %v4426_v19, %v983_v38  ;;  %v1995_v34 = vld [vmem:[#allocation4 + $0x61] sm:$0xff]  ;;  %v3374_v19 = vld [vmem:[%s4398_s8 + $0x58] sm:$0xff] }
 0x399   :  { %v1492_v45 = vpop.f32.mrf.mxu3 }
 0x39a   :  { %v1926_v51 = vadd.f32 %v4081_v54, %v1910_v7  ;;  %v1512_v1 = vadd.f32 %v1492_v45, %v1379_v48 }
 0x39c   :  { %v1938_v20 = vmax.f32 %v1926_v51, 0.0  ;;  %v1645_v14 = vadd.f32 %v1625_v21, %v1512_v1 }
 0x39d   :  { %v1974_v15 = vld [vmem:[#allocation4 + $0x21] sm:$0xff] }
 0x39e   :  { %1950 = vst [vmem:[#allocation4 + $0x30] sm:$0xff] %v1938_v20  ;;  %v1778_v30 = vadd.f32 %v1758_v56, %v1645_v14  ;;  %v1986_v31 = vmax.f32 %v1936_v37, %v1974_v15  ;;  %v1116_v37 = vadd.f32 %v4421_v0, %v981_v46  ;;  %v1763_v8 = vpop.f32.mrf.mxu1  ;;  %v1896_v60 = vpop.f32.mrf.mxu0 }
 0x39f   :  { %v1633_v48 = vpop.f32.mrf.mxu2 }
 0x3a0   :  { %v1911_v29 = vadd.f32 %v1891_v3, %v1778_v30  ;;  %v2000_v44 = vmax.f32 %v1985_v22, %v1986_v31  ;;  %v4427_v3 = vld [vmem:[#allocation15_spill] sm:$0xff] }
 0x3a1   :  { %v1495_v57 = vpop.f32.mrf.mxu3 }
 0x3a2   :  { %v4129_v41 = vadd.f32 %v4081_v54, %v1911_v29  ;;  %v1513_v12 = vadd.f32 %v1495_v57, %v1380_v17  ;;  %v4131_v5 = vpack.c.bf16 %v2000_v44, %v1999_v9 }
 0x3a4   :  { %v1939_v2 = vmax.f32 %v4129_v41, 0.0  ;;  %v1646_v10 = vadd.f32 %v1628_v53, %v1513_v12  ;;  %v4428_v53 = vld [vmem:[#allocation17_spill] sm:$0xff]  ;;  %v3378_v41 = vld [vmem:[%s4398_s8 + $0x78] sm:$0xff] }
 0x3a5   :  { %v1975_v36 = vld [vmem:[#allocation4 + $0x29] sm:$0xff]  ;;  %v1250_v15 = vadd.f32 %v4428_v53, %v1117_v40  ;;  %2168 = vmatpush.bf16.msrb.mxu2 %v3378_v41 }
 0x3a6   :  { %1951 = vst [vmem:[#allocation4 + $0x38] sm:$0xff] %v1939_v2  ;;  %v1779_v59 = vadd.f32 %v1761_v42, %v1646_v10  ;;  %v1987_v28 = vmax.f32 %v1937_v62, %v1975_v36  ;;  %v1249_v62 = vadd.f32 %v4425_v63, %v1116_v37  ;;  %v1766_v27 = vpop.f32.mrf.mxu1  ;;  %v1899_v30 = vpop.f32.mrf.mxu0  ;;  %v4429_v42 = vld [vmem:[#allocation18_spill] sm:$0xff]  ;;  %v3373_v40 = vld [vmem:[%s4398_s8 + $0x50] sm:$0xff]  ;;  %v3382_v53 = vld [vmem:[%s4398_s8 + $0x98] sm:$0xff] }
 0x3a7   :  { %v1383_v24 = vadd.f32 %v4429_v42, %v1250_v15  ;;  %v1635_v44 = vpop.f32.mrf.mxu2  ;;  %v3393_v15 = vld [vmem:[%s4398_s8 + $0xf0] sm:$0xff]  ;;  %v3402_v42 = vld [vmem:[%s4398_s8 + $0x138] sm:$0xff] }
 0x3a8   :  { %v1912_v23 = vadd.f32 %v1894_v26, %v1779_v59  ;;  %v2001_v4 = vmax.f32 %v1986_v31, %v1987_v28  ;;  %v1382_v55 = vadd.f32 %v4427_v3, %v1249_v62  ;;  %v3376_v62 = vld [vmem:[%s4398_s8 + $0x68] sm:$0xff]  ;;  %v3371_v3 = vld [vmem:[%s4398_s8 + $0x40] sm:$0xff]  ;;  %v3405_v41 = vld [vmem:[%s4398_s8 + $0x150] sm:$0xff] }
 0x3a9   :  { %v1497_v25 = vpop.f32.mrf.mxu3 }
 0x3aa   :  { %v1928_v50 = vadd.f32 %v4081_v54, %v1912_v23  ;;  %v1514_v6 = vadd.f32 %v1497_v25, %v1381_v13 }
 0x3ac   :  { %v1940_v61 = vmax.f32 %v1928_v50, 0.0  ;;  %v1647_v21 = vadd.f32 %v1630_v49, %v1514_v6 }
 0x3ad   :  { %v1976_v43 = vld [vmem:[#allocation4 + $0x31] sm:$0xff] }
 0x3ae   :  { %1952 = vst [vmem:[#allocation4 + $0x40] sm:$0xff] %v1940_v61  ;;  %v1780_v39 = vadd.f32 %v1763_v8, %v1647_v21  ;;  %v1988_v56 = vmax.f32 %v1938_v20, %v1976_v43  ;;  %v1768_v12 = vpop.f32.mrf.mxu1  ;;  %v1901_v11 = vpop.f32.mrf.mxu0  ;;  %v3368_v43 = vld [vmem:[%s4398_s8 + $0x28] sm:$0xff] }
 0x3b0   :  { %v1913_v22 = vadd.f32 %v1896_v60, %v1780_v39  ;;  %v2002_v7 = vmax.f32 %v1987_v28, %v1988_v56  ;;  %v3423_v28 = vld [vmem:[#allocation2 + $0xc0] sm:$0xff] }
 0x3b1   :  { %v1500_v9 = vpop.f32.mrf.mxu3  ;;  %v1996_v49 = vmax.f32 %v3423_v28, %v1995_v34  ;;  %v3375_v39 = vld [vmem:[%s4398_s8 + $0x60] sm:$0xff] }
 0x3b2   :  { %v1929_v45 = vadd.f32 %v4081_v54, %v1913_v22  ;;  %v1515_v51 = vadd.f32 %v1500_v9, %v1382_v55  ;;  %v2017_v1 = vpack.c.bf16 %v2002_v7, %v2001_v4  ;;  %v3372_v22 = vld [vmem:[%s4398_s8 + $0x48] sm:$0xff]  ;;  %v3386_v55 = vld [vmem:[%s4398_s8 + $0xb8] sm:$0xff]  ;;  %v3362_v7 = vld [vmem:[%s4396_s6 + $0x10] sm:$0xff] }
 0x3b3   :  { %v3384_v9 = vld [vmem:[%s4398_s8 + $0xa8] sm:$0xff]  ;;  %v2070_v34 = vld [vmem:[%s4397_s7] sm:$0xff] }
 0x3b4   :  { %v1941_v14 = vmax.f32 %v1929_v45, 0.0  ;;  %v1648_v52 = vadd.f32 %v1633_v48, %v1515_v51  ;;  %v3385_v48 = vld [vmem:[%s4398_s8 + $0xb0] sm:$0xff]  ;;  %v3383_v45 = vld [vmem:[%s4398_s8 + $0xa0] sm:$0xff] }
 0x3b5   :  { %v1977_v60 = vld [vmem:[#allocation4 + $0x39] sm:$0xff] }
 0x3b6   :  { %1953 = vst [vmem:[#allocation4 + $0x48] sm:$0xff] %v1941_v14  ;;  %v1781_v20 = vadd.f32 %v1766_v27, %v1648_v52  ;;  %v1989_v35 = vmax.f32 %v1939_v2, %v1977_v60  ;;  %v3370_v2 = vld [vmem:[%s4398_s8 + $0x38] sm:$0xff]  ;;  %v3367_v51 = vld [vmem:[%s4398_s8 + $0x20] sm:$0xff]  ;;  %v3365_v27 = vld [vmem:[%s4398_s8 + $0x10] sm:$0xff] }
 0x3b7   :  { %2229 = vmatpush.bf16.msrb.mxu1 %v3370_v2  ;;  %v3364_v52 = vld [vmem:[%s4398_s8 + $0x8] sm:$0xff]  ;;  %v3407_v60 = vld [vmem:[%s4398_s8 + $0x160] sm:$0xff] }
 0x3b8   :  { %v1914_v31 = vadd.f32 %v1899_v30, %v1781_v20  ;;  %v2003_v21 = vmax.f32 %v1988_v56, %v1989_v35  ;;  %v3361_v56 = vld [vmem:[%s4396_s6 + $0x8] sm:$0xff]  ;;  %v3363_v30 = vld [vmem:[%s4398_s8] sm:$0xff]  ;;  %v3381_v20 = vld [vmem:[%s4398_s8 + $0x90] sm:$0xff] }
 0x3b9   :  { %v1502_v29 = vpop.f32.mrf.mxu3 }
 0x3ba   :  { %v1930_v16 = vadd.f32 %v4081_v54, %v1914_v31  ;;  %v1516_v17 = vadd.f32 %v1502_v29, %v1383_v24  ;;  %v3392_v31 = vld [vmem:[%s4398_s8 + $0xe8] sm:$0xff]  ;;  %v3391_v29 = vld [vmem:[%s4398_s8 + $0xe0] sm:$0xff] }
 0x3bb   :  { %v3380_v24 = vld [vmem:[%s4398_s8 + $0x88] sm:$0xff] }
 0x3bc   :  { %v1942_v26 = vmax.f32 %v1930_v16, 0.0  ;;  %v1649_v57 = vadd.f32 %v1635_v44, %v1516_v17  ;;  %v3401_v16 = vld [vmem:[%s4398_s8 + $0x130] sm:$0xff]  ;;  %v3379_v17 = vld [vmem:[%s4398_s8 + $0x80] sm:$0xff]  ;;  %v3390_v44 = vld [vmem:[%s4398_s8 + $0xd8] sm:$0xff] }
 0x3bd   :  { %v1978_v59 = vld [vmem:[#allocation4 + $0x41] sm:$0xff] }
 0x3be   :  { %1954 = vst [vmem:[#allocation4 + $0x50] sm:$0xff] %v1942_v26  ;;  %v1782_v18 = vadd.f32 %v1768_v12, %v1649_v57  ;;  %v1990_v4 = vmax.f32 %v1940_v61, %v1978_v59  ;;  %v3360_v61 = vld [vmem:[%s4396_s6] sm:$0xff]  ;;  %v3389_v57 = vld [vmem:[%s4398_s8 + $0xd0] sm:$0xff] }
 0x3bf   :  { %v3399_v12 = vld [vmem:[%s4398_s8 + $0x120] sm:$0xff] }
 0x3c0   :  { %v1915_v46 = vadd.f32 %v1901_v11, %v1782_v18  ;;  %v2004_v38 = vmax.f32 %v1989_v35, %v1990_v4  ;;  %v3388_v18 = vld [vmem:[%s4398_s8 + $0xc8] sm:$0xff]  ;;  %v3398_v11 = vld [vmem:[%s4398_s8 + $0x118] sm:$0xff]  ;;  %v3395_v59 = vld [vmem:[%s4398_s8 + $0x100] sm:$0xff] }
 0x3c2   :  { %v1931_v10 = vadd.f32 %v4081_v54, %v1915_v46  ;;  %v2018_v63 = vpack.c.bf16 %v2004_v38, %v2003_v21  ;;  %v3387_v46 = vld [vmem:[%s4398_s8 + $0xc0] sm:$0xff]  ;;  %v3406_v38 = vld [vmem:[%s4398_s8 + $0x158] sm:$0xff] }
 0x3c4   :  { %v1943_v33 = vmax.f32 %v1931_v10, 0.0  ;;  %v3397_v10 = vld [vmem:[%s4398_s8 + $0x110] sm:$0xff] }
 0x3c5   :  { %v1979_v36 = vld [vmem:[#allocation4 + $0x49] sm:$0xff] }
 0x3c6   :  { %1955 = vst [vmem:[#allocation4 + $0x58] sm:$0xff] %v1943_v33  ;;  %v1991_v0 = vmax.f32 %v1941_v14, %v1979_v36  ;;  %v3394_v14 = vld [vmem:[%s4398_s8 + $0xf8] sm:$0xff] }
 0x3c8   :  { %v2005_v50 = vmax.f32 %v1990_v4, %v1991_v0  ;;  %v3409_v4 = vld [vmem:[%s4398_s8 + $0x170] sm:$0xff] }
 0x3cd   :  { %v1980_v37 = vld [vmem:[#allocation4 + $0x51] sm:$0xff]  ;;  %v1981_v23 = vld [vmem:[#allocation4 + $0x59] sm:$0xff] }
 0x3ce   :  { %v1992_v32 = vmax.f32 %v1942_v26, %v1980_v37  ;;  %v1993_v13 = vmax.f32 %v1943_v33, %v1981_v23  ;;  %v3400_v26 = vld [vmem:[%s4398_s8 + $0x128] sm:$0xff] }
 0x3cf   :  { %v3396_v33 = vld [vmem:[%s4398_s8 + $0x108] sm:$0xff] }
 0x3d0   :  { %v2007_v8 = vmax.f32 %v1992_v32, %v1993_v13  ;;  %v2008_v25 = vmax.f32 %v1993_v13, %v1996_v49  ;;  %v2006_v6 = vmax.f32 %v1991_v0, %v1992_v32  ;;  %v2071_v0 = vld [vmem:[%s4397_s7 + $0x8] sm:$0xff]  ;;  %v3410_v32 = vld [vmem:[%s4398_s8 + $0x178] sm:$0xff] }
 0x3d2   :  { %v2020_v58 = vpack.c.bf16 %v2008_v25, %v2007_v8  ;;  %v2019_v54 = vpack.c.bf16 %v2006_v6, %v2005_v50  ;;  %v3408_v25 = vld [vmem:[%s4398_s8 + $0x168] sm:$0xff]  ;;  %v2072_v50 = vld [vmem:[%s4397_s7 + $0x10] sm:$0xff]  ;;  %v2073_v6 = vld [vmem:[%s4397_s7 + $0x18] sm:$0xff] }
 0x3d4   :  { %2048 = vmatpush.bf16.msrb.mxu3 %v2020_v58 }
 0x3d8   :  { %2049 = vmatpush.bf16.msrb.mxu3 %v2019_v54 }
 0x3dc   :  { %2050 = vmatpush.bf16.msrb.mxu3 %v2018_v63 }
 0x3e0   :  { %2051 = vmatpush.bf16.msrb.mxu3 %v2017_v1  ;;  %v3366_v1 = vld [vmem:[%s4398_s8 + $0x18] sm:$0xff] }
 0x3e4   :  { %2052 = vmatpush.bf16.msrb.mxu3 %v4131_v5  ;;  %v3377_v5 = vld [vmem:[%s4398_s8 + $0x70] sm:$0xff] }
 0x3e5   :  { %2169 = vmatpush.bf16.msrb.mxu2 %v3377_v5 }
 0x3e8   :  { %2053 = vmatpush.bf16.msrb.mxu3 %v4115_v47  ;;  %v3369_v47 = vld [vmem:[%s4398_s8 + $0x30] sm:$0xff] }
 0x3e9   :  { %2230 = vmatpush.bf16.msrb.mxu1 %v3369_v47  ;;  %2170 = vmatpush.bf16.msrb.mxu2 %v3376_v62  ;;  %v3404_v47 = vld [vmem:[%s4398_s8 + $0x148] sm:$0xff] }
 0x3eb   :  { %3059 = vmatmul.msk.bf16.vlgmr.msrb.gmra.mxu3 %vm2036_vm1, %v3360_v61  ;;  %v2074_v61 = vld [vmem:[%s4397_s7 + $0x20] sm:$0xff] }
 0x3ec   :  { %2384 = vmatpush.bf16.msra.mxu3 %v3394_v14  ;;  %v2573_v14 = vld [vmem:[%s4400_s10 + $0x40] sm:$0xff] }
 0x3ed   :  { %2231 = vmatpush.bf16.msrb.mxu1 %v3368_v43  ;;  %2171 = vmatpush.bf16.msrb.mxu2 %v3375_v39  ;;  %v2075_v43 = vld [vmem:[%s4397_s7 + $0x28] sm:$0xff]  ;;  %v3403_v39 = vld [vmem:[%s4398_s8 + $0x140] sm:$0xff] }
 0x3f0   :  { %2385 = vmatpush.bf16.msra.mxu3 %v3393_v15  ;;  %v2571_v15 = vld [vmem:[%s4400_s10 + $0x30] sm:$0xff] }
 0x3f1   :  { %2172 = vmatpush.bf16.msrb.mxu2 %v3374_v19  ;;  %2232 = vmatpush.bf16.msrb.mxu1 %v3367_v51  ;;  %v2576_v51 = vld [vmem:[%s4400_s10 + $0x58] sm:$0xff] }
 0x3f4   :  { %2386 = vmatpush.bf16.msra.mxu3 %v3392_v31 }
 0x3f5   :  { %2173 = vmatpush.bf16.msrb.mxu2 %v3373_v40  ;;  %2233 = vmatpush.bf16.msrb.mxu1 %v3366_v1  ;;  %v2575_v1 = vld [vmem:[%s4400_s10 + $0x50] sm:$0xff] }
 0x3f8   :  { %2387 = vmatpush.bf16.msra.mxu3 %v3391_v29 }
 0x3f9   :  { %2174 = vmatpush.bf16.msrb.mxu2 %v3372_v22  ;;  %2234 = vmatpush.bf16.msrb.mxu1 %v3365_v27  ;;  %v2574_v27 = vld [vmem:[%s4400_s10 + $0x48] sm:$0xff] }
 0x3fb   :  { %3060 = vmatmul.msk.bf16.gmra.mxu3 %vm2036_vm1, %v3361_v56 }
 0x3fc   :  { %2388 = vmatpush.bf16.msra.mxu3 %v3390_v44  ;;  %v2566_v44 = vld [vmem:[%s4400_s10 + $0x8] sm:$0xff] }
 0x3fd   :  { %2175 = vmatpush.bf16.msrb.mxu2 %v3371_v3  ;;  %2235 = vmatpush.bf16.msrb.mxu1 %v3364_v52  ;;  %v2580_v3 = vld [vmem:[%s4400_s10 + $0x78] sm:$0xff] }
 0x400   :  { %2389 = vmatpush.bf16.msra.mxu3 %v3389_v57  ;;  %v2565_v57 = vld [vmem:[%s4400_s10] sm:$0xff] }
 0x401   :  { %2306 = vmatpush.bf16.msra.mxu2 %v3386_v55  ;;  %2236 = vmatpush.bf16.msrb.mxu1 %v3363_v30  ;;  %v2579_v55 = vld [vmem:[%s4400_s10 + $0x70] sm:$0xff]  ;;  %v2570_v30 = vld [vmem:[%s4400_s10 + $0x28] sm:$0xff] }
 0x404   :  { %2390 = vmatpush.bf16.msra.mxu3 %v3388_v18 }
 0x405   :  { %2307 = vmatpush.bf16.msra.mxu2 %v3385_v48  ;;  %2462 = vmatpush.bf16.msra.mxu1 %v3402_v42  ;;  %v2578_v48 = vld [vmem:[%s4400_s10 + $0x68] sm:$0xff] }
 0x408   :  { %2391 = vmatpush.bf16.msra.mxu3 %v3387_v46 }
 0x409   :  { %2308 = vmatpush.bf16.msra.mxu2 %v3384_v9  ;;  %2463 = vmatpush.bf16.msra.mxu1 %v3401_v16  ;;  %v2577_v9 = vld [vmem:[%s4400_s10 + $0x60] sm:$0xff]  ;;  %v2567_v16 = vld [vmem:[%s4400_s10 + $0x10] sm:$0xff] }
 0x40b   :  { %3061 = vmatmul.msk.bf16.gmra.mxu3 %vm2036_vm1, %v3362_v7 }
 0x40c   :  { %2585 = vmatpush.msrb.mxu3 %v2580_v3 }
 0x40d   :  { %2309 = vmatpush.bf16.msra.mxu2 %v3383_v45  ;;  %2464 = vmatpush.bf16.msra.mxu1 %v3400_v26 }
 0x40e   :  { %2586 = vmatpush.msrb.mxu3 %v2579_v55 }
 0x410   :  { %2587 = vmatpush.msrb.mxu3 %v2578_v48 }
 0x411   :  { %2310 = vmatpush.bf16.msra.mxu2 %v3382_v53  ;;  %2465 = vmatpush.bf16.msra.mxu1 %v3399_v12  ;;  %v2572_v53 = vld [vmem:[%s4400_s10 + $0x38] sm:$0xff] }
 0x412   :  { %2588 = vmatpush.msrb.mxu3 %v2577_v9 }
 0x414   :  { %2589 = vmatpush.msrb.mxu3 %v2576_v51 }
 0x415   :  { %2311 = vmatpush.bf16.msra.mxu2 %v3381_v20  ;;  %2466 = vmatpush.bf16.msra.mxu1 %v3398_v11  ;;  %v2569_v20 = vld [vmem:[%s4400_s10 + $0x20] sm:$0xff] }
 0x416   :  { %2590 = vmatpush.msrb.mxu3 %v2575_v1 }
 0x418   :  { %2591 = vmatpush.msrb.mxu3 %v2574_v27 }
 0x419   :  { %2312 = vmatpush.bf16.msra.mxu2 %v3380_v24  ;;  %2467 = vmatpush.bf16.msra.mxu1 %v3397_v10  ;;  %v2568_v24 = vld [vmem:[%s4400_s10 + $0x18] sm:$0xff] }
 0x41a   :  { %2592 = vmatpush.msrb.mxu3 %v2573_v14 }
 0x41c   :  { %2593 = vmatpush.msrb.mxu3 %v2572_v53 }
 0x41d   :  { %2313 = vmatpush.bf16.msra.mxu2 %v3379_v17  ;;  %2468 = vmatpush.bf16.msra.mxu1 %v3396_v33  ;;  %v3417_v33 = vld [vmem:[%s4399_s9] ss:$0 sm:$0xff] }
 0x41e   :  { %2594 = vmatpush.msrb.mxu3 %v2571_v15 }
 0x420   :  { %2595 = vmatpush.msrb.mxu3 %v2570_v30 }
 0x421   :  { %2469 = vmatpush.bf16.msra.mxu1 %v3395_v59 }
 0x422   :  { %2596 = vmatpush.msrb.mxu3 %v2569_v20 }
 0x424   :  { %2597 = vmatpush.msrb.mxu3 %v2568_v24 }
 0x426   :  { %2598 = vmatpush.msrb.mxu3 %v2567_v16 }
 0x428   :  { %2599 = vmatpush.msrb.mxu3 %v2566_v44 }
 0x42a   :  { %2600 = vmatpush.msrb.mxu3 %v2565_v57 }
 0x46e   :  { %v2055_v36 = vpop.f32.mrf.mxu3 }
 0x46f   :  { %v2076_v28 = vmul.f32 %v2070_v34, %v2055_v36 }
 0x471   :  { %v2082_v49 = vpack.c.bf16 %v2076_v28, %v2076_v28 }
 0x473   :  { %2237 = vmatmul.bf16.vlgmr.msrb.gmra.mxu1 %v2082_v49 }
 0x476   :  { %v2057_v37 = vpop.f32.mrf.mxu3 }
 0x477   :  { %v2077_v23 = vmul.f32 %v2071_v0, %v2057_v37 }
 0x479   :  { %v2083_v13 = vpack.c.bf16 %v2077_v23, %v2077_v23 }
 0x47b   :  { %2176 = vmatmul.bf16.vlgmr.msrb.gmra.mxu2 %v2083_v13  ;;  %v3418_v13 = vld [vmem:[%s4401_s11] ss:$0 sm:$0xff] }
 0x47c   :  { %2540 = vmatpush.bf16.msrb.mxu2 %v3410_v32 }
 0x47e   :  { %v2060_v8 = vpop.f32.mrf.mxu3 }
 0x47f   :  { %v2078_v58 = vmul.f32 %v2072_v50, %v2060_v8 }
 0x480   :  { %2541 = vmatpush.bf16.msrb.mxu2 %v3409_v4 }
 0x481   :  { %v2084_v21 = vpack.c.bf16 %v2078_v58, %v2078_v58 }
 0x484   :  { %2542 = vmatpush.bf16.msrb.mxu2 %v3408_v25 }
 0x486   :  { %v2062_v54 = vpop.f32.mrf.mxu3 }
 0x487   :  { %v2079_v35 = vmul.f32 %v2073_v6, %v2062_v54 }
 0x488   :  { %2543 = vmatpush.bf16.msrb.mxu2 %v3407_v60 }
 0x489   :  { %v2085_v63 = vpack.c.bf16 %v2079_v35, %v2079_v35 }
 0x48b   :  { %2314 = vmatmul.bf16.vlgmr.msra.gmra.mxu2 %v2084_v21  ;;  %2392 = vmatmul.bf16.vlgmr.msra.gmra.mxu3 %v2085_v63 }
 0x48c   :  { %2544 = vmatpush.bf16.msrb.mxu2 %v3406_v38 }
 0x48e   :  { %v2065_v2 = vpop.f32.mrf.mxu3 }
 0x48f   :  { %v2080_v5 = vmul.f32 %v2074_v61, %v2065_v2 }
 0x490   :  { %2545 = vmatpush.bf16.msrb.mxu2 %v3405_v41 }
 0x491   :  { %v2086_v62 = vpack.c.bf16 %v2080_v5, %v2080_v5 }
 0x493   :  { %2470 = vmatmul.bf16.vlgmr.msra.gmra.mxu1 %v2086_v62 }
 0x494   :  { %2546 = vmatpush.bf16.msrb.mxu2 %v3404_v47 }
 0x496   :  { %v2067_v56 = vpop.f32.mrf.mxu3 }
 0x497   :  { %v2081_v19 = vmul.f32 %v2075_v43, %v2067_v56 }
 0x498   :  { %2547 = vmatpush.bf16.msrb.mxu2 %v3403_v39 }
 0x499   :  { %v2087_v40 = vpack.c.bf16 %v2081_v19, %v2081_v19 }
 0x49b   :  { %2548 = vmatmul.bf16.vlgmr.msrb.gmra.mxu2 %v2087_v40 }
 0x4f0   :  { %v2238_v22 = vpop.f32.mrf.mxu1 }
 0x4f8   :  { %v2240_v7 = vpop.f32.mrf.mxu1 }
 0x4fe   :  { %v2177_v45 = vpop.f32.mrf.mxu2 }
 0x4ff   :  { %v2239_v17 = vadd.f32 %v2238_v22, %v2177_v45 }
 0x506   :  { %v2179_v52 = vpop.f32.mrf.mxu2 }
 0x50e   :  { %v2315_v31 = vpop.f32.mrf.mxu2  ;;  %v2393_v42 = vpop.f32.mrf.mxu3 }
 0x50f   :  { %v2319_v26 = vadd.f32 %v2315_v31, %v2239_v17 }
 0x510   :  { %v2471_v29 = vpop.f32.mrf.mxu1 }
 0x511   :  { %v2397_v46 = vadd.f32 %v2393_v42, %v2319_v26 }
 0x513   :  { %v2475_v10 = vadd.f32 %v2471_v29, %v2397_v46 }
 0x516   :  { %v2317_v12 = vpop.f32.mrf.mxu2  ;;  %v2395_v18 = vpop.f32.mrf.mxu3 }
 0x518   :  { %v2473_v11 = vpop.f32.mrf.mxu1 }
 0x51e   :  { %v2549_v34 = vpop.f32.mrf.mxu2 }
 0x51f   :  { %v2553_v36 = vadd.f32 %v2549_v34, %v2475_v10 }
 0x521   :  { %v2558_v59 = vadd.f32 %v3417_v33, %v2553_v36 }
 0x523   :  { %v2559_v28 = vsub.f32 0.0, %v2558_v59 }
 0x525   :  { %v2560_v49 = vmul.f32 1.442695, %v2559_v28 }
 0x526   :  { %v2551_v0 = vpop.f32.mrf.mxu2 }
 0x527   :  { %3419 = vpow2.f32 %v2560_v49 }
 0x52d   :  { %v3420_v37 = vpop.eup %3419 }
 0x52e   :  { %v2562_v23 = vadd.f32 1.0, %v3420_v37 }
 0x530   :  { %3421 = vrcp.f32 %v2562_v23 }
 0x536   :  { %v3422_v32 = vpop.eup %3421 }
 0x537   :  { %2564 = vst [vmem:[%s4403_s13] sm:$0xff] %v3422_v32  ;;  %2601 = vmatmul.f32.vlgmr.msrb.gmra.mxu3 %v3422_v32 }
 0x5ba   :  { %v2602_v4 = vpop.f32.mrf.mxu3 }
 0x5bb   :  { %v2603_v8 = vadd.f32 %v3418_v13, %v2602_v4 }
 0x5bd   :  { %2605 = vst [vmem:[%s4402_s12] sm:$0xff] %v2603_v8 }
 0x5be   :  { %2614 = vsyncpa [#allocation6], 1 }

</bundles_post_ra>
